<compile_context>
chip_gen: v5e
topology: v5e:2x2
jax: 0.10.0
libtpu: 0.0.40
codegen_flags: <defaults>
</compile_context>

<pallas_src>
import jax
import jax.numpy as jnp
from jax.experimental import pallas as pl
from jax.experimental.pallas import tpu as pltpu


def _hardswish(y):
    return y * jnp.clip(y + 3.0, 0.0, 6.0) * (1.0 / 6.0)


def _sigmoid(y):
    # Stable sigmoid via tanh (single EUP op, no inf intermediates).
    return 0.5 * (jnp.tanh(0.5 * y) + 1.0)


def _per_sample_transpose(m, bn, r, c):
    """(bn*r, c) -> (bn*c, r): transpose each sample's (r, c) block (bn static)."""
    if bn == 1:
        return m.T
    return jnp.concatenate(
        [m[b * r:(b + 1) * r, :].T for b in range(bn)], axis=0)


def _make_kernel(T, V):
    TV = T * V
    P = T + V
    HI = jax.lax.Precision.HIGHEST

    def kernel(x_ref, expp_ref, expg_ref, w1_ref, fcnv_ref, wtv_ref,
               chv_ref, wse1_ref, wse2_ref, o_ref):
        f32 = jnp.float32
        Bn, C, _ = x_ref.shape
        x = x_ref[...].astype(f32)                            # (Bn, C, TV)
        x2 = x.reshape(Bn * C, TV)

        # ---- pooled descriptors [mean_V(x) | mean_T(x)]: one MXU call -----
        pooled = jnp.dot(x2, expp_ref[...],
                         preferred_element_type=f32, precision=HI)   # (Bn*C, P)

        # channels-last view of the tiny pooled tensor for the 1x1 convs
        pooled_cl = _per_sample_transpose(pooled, Bn, C, P)           # (Bn*P, C)

        # ---- shared fcn: Conv1x1 -> folded BN -> Hardswish (one MXU call) -
        fv = fcnv_ref[...]                                            # (3, Ci)
        b1, s1, h1 = fv[0:1], fv[1:2], fv[2:3]
        a = jnp.dot(pooled_cl, w1_ref[...],
                    preferred_element_type=f32, precision=HI)         # (Bn*P, Ci)
        a = _hardswish((a + b1) * s1 + h1)

        # ---- conv_t & conv_v fused into one MXU call ----------------------
        cv = chv_ref[...]                                             # (4, C)
        bt, bv, s2, h2 = cv[0:1], cv[1:2], cv[2:3], cv[3:4]
        att = jnp.dot(a, wtv_ref[...],
                      preferred_element_type=f32, precision=HI)       # (Bn*P, 2C)
        att_t_cl = _sigmoid(att[:, :C] + bt) * s2   # fold output-BN scale here
        att_v_cl = _sigmoid(att[:, C:] + bv)

        # back to channel-major (Bn*C, P); zero the invalid half of each gate
        pidx = jax.lax.broadcasted_iota(jnp.int32, (1, P), 1)
        att_t = jnp.where(pidx < T,
                          _per_sample_transpose(att_t_cl, Bn, P, C), 0.0)
        att_v = jnp.where(pidx >= T,
                          _per_sample_transpose(att_v_cl, Bn, P, C), 0.0)

        # ---- SE channel gate, batched over the Bn samples in the block ----
        mask_t = jax.lax.broadcasted_iota(jnp.int32, (1, P, 1), 1) < T
        se_pool = jnp.sum(jnp.where(mask_t, pooled_cl.reshape(Bn, P, C), 0.0),
                          axis=1) * (1.0 / T)                         # (Bn, C)
        z = jnp.maximum(jnp.dot(se_pool, wse1_ref[...],
                                preferred_element_type=f32, precision=HI), 0.0)
        se = _sigmoid(jnp.dot(z, wse2_ref[...],
                              preferred_element_type=f32, precision=HI))
        se_s = se * s2                                                # (Bn, C)

        # ---- expand T/V gates onto the lane-dense T*V axis: two MXU calls -
        expg = expg_ref[...]
        gate_t = jnp.dot(att_t, expg, preferred_element_type=f32,
                         precision=HI).reshape(Bn, C, TV)
        gate_v = jnp.dot(att_v, expg, preferred_element_type=f32,
                         precision=HI).reshape(Bn, C, TV)

        # ---- fused epilogue: x * ((att_t*att_v + se) * s2) + h2, hardswish
        gate = gate_t * gate_v + se_s[:, :, None]
        y = x * gate + h2[:, :, None]
        o_ref[...] = _hardswish(y).astype(o_ref.dtype)

    return kernel


def stc_att2(x_nchw, params, *, max_block_bytes=1 << 20):
    """Pallas STC_Att2 forward.  x_nchw: (N, C, T, V) -> same shape/dtype."""
    w1, fcnv, wtv, chv, wse1, wse2 = params
    N, C, T, V = x_nchw.shape
    TV, P = T * V, T + V

    x = x_nchw.reshape(N, C, TV)                   # metadata-only reshape

    # Pooling / expansion constants (tiny, VMEM-resident across grid steps).
    q = jnp.arange(TV)
    row_t = (q[None, :] // V == jnp.arange(T)[:, None]).astype(jnp.float32)  # (T, TV)
    row_v = (q[None, :] % V == jnp.arange(V)[:, None]).astype(jnp.float32)   # (V, TV)
    expg = jnp.concatenate([row_t, row_v], axis=0)                           # (P, TV)
    expp = jnp.concatenate([row_t / V, row_v / T], axis=0).T                 # (TV, P)

    # Samples per grid step: big DMA blocks, but keep >= 2 steps (v7x 2 TCs).
    itemsize = jnp.dtype(x_nchw.dtype).itemsize
    per_sample = 2 * C * TV * itemsize             # in + out bytes
    bn = max(1, min(N, max_block_bytes // max(per_sample, 1)))
    if N >= 2:
        bn = max(1, min(bn, N // 2))
    while N % bn:
        bn -= 1

    kernel = _make_kernel(T, V)

    def const_spec(a):
        nd = a.ndim
        return pl.BlockSpec(a.shape, lambda n: (0,) * nd)

    # Scoped-VMEM budget: double-buffered activation blocks + f32 intermediates
    # + resident weights, with headroom; stays well under v7x's 64 MiB.
    blk_f32 = bn * C * TV * 4
    vmem_limit = int(min(48 << 20, max(16 << 20, 10 * blk_f32 + (4 << 20))))

    out = pl.pallas_call(
        kernel,
        out_shape=jax.ShapeDtypeStruct((N, C, TV), x_nchw.dtype),
        grid=(N // bn,),
        in_specs=[
            pl.BlockSpec((bn, C, TV), lambda n: (n, 0, 0)),
            const_spec(expp), const_spec(expg),
            const_spec(w1), const_spec(fcnv), const_spec(wtv),
            const_spec(chv), const_spec(wse1), const_spec(wse2),
        ],
        out_specs=pl.BlockSpec((bn, C, TV), lambda n: (n, 0, 0)),
        compiler_params=pltpu.CompilerParams(
            dimension_semantics=("parallel",),
            vmem_limit_bytes=vmem_limit),
    )(x, expp, expg, w1, fcnv, wtv, chv, wse1, wse2)

    return out.reshape(N, C, T, V)


def make_params(key, channel, reduct_ratio, se_reduction=16, eps=1e-5):
    """Random PyTorch-style params, folded/packed for the kernel layout."""
    Ci = channel // reduct_ratio
    Cr = max(channel // se_reduction, 1)
    f32 = jnp.float32
    ks = jax.random.split(key, 16)

    # PyTorch-layout parameters ------------------------------------------
    w1_oi = 0.2 * jax.random.normal(ks[0], (Ci, channel), f32)   # fcn conv (out, in)
    b1 = 0.1 * jax.random.normal(ks[1], (Ci,), f32)
    g1 = 1.0 + 0.1 * jax.random.normal(ks[2], (Ci,), f32)        # BN1 gamma
    be1 = 0.1 * jax.random.normal(ks[3], (Ci,), f32)             # BN1 beta
    rm1 = 0.1 * jax.random.normal(ks[4], (Ci,), f32)             # BN1 running mean
    rv1 = jax.random.uniform(ks[5], (Ci,), f32, minval=0.5, maxval=1.5)

    wt_oi = 0.2 * jax.random.normal(ks[6], (channel, Ci), f32)   # conv_t (out, in)
    bt = 0.1 * jax.random.normal(ks[7], (channel,), f32)
    wv_oi = 0.2 * jax.random.normal(ks[8], (channel, Ci), f32)   # conv_v (out, in)
    bv = 0.1 * jax.random.normal(ks[9], (channel,), f32)

    wse1_oi = 0.2 * jax.random.normal(ks[10], (Cr, channel), f32)  # SE fc1 (no bias)
    wse2_oi = 0.2 * jax.random.normal(ks[11], (channel, Cr), f32)  # SE fc2 (no bias)

    g2 = 1.0 + 0.1 * jax.random.normal(ks[12], (channel,), f32)  # BN2 gamma
    be2 = 0.1 * jax.random.normal(ks[13], (channel,), f32)
    rm2 = 0.1 * jax.random.normal(ks[14], (channel,), f32)
    rv2 = jax.random.uniform(ks[15], (channel,), f32, minval=0.5, maxval=1.5)

    # Fold BatchNorm to per-channel scale/shift (inference mode).
    # TODO(synk): training-mode BatchNorm batch statistics (cross-sample
    # reduction) are not computed in-kernel; running-stats folding is used.
    s1 = g1 / jnp.sqrt(rv1 + eps)
    h1 = be1 - rm1 * s1
    s2 = g2 / jnp.sqrt(rv2 + eps)
    h2 = be2 - rm2 * s2

    # Kernel layout: channels-last matmul weights + packed per-channel vectors.
    return (
        w1_oi.T,                                                  # (C, Ci)
        jnp.stack([b1, s1, h1], axis=0),                          # (3, Ci)
        jnp.concatenate([wt_oi.T, wv_oi.T], axis=1),              # (Ci, 2C)
        jnp.stack([bt, bv, s2, h2], axis=0),                      # (4, C)
        wse1_oi.T,                                                # (C, Cr)
        wse2_oi.T,                                                # (Cr, C)
    )


def stc_att2_reference(x_nchw, params):
    """Pure-JAX reference (same folded params), for correctness checking."""
    w1, fcnv, wtv, chv, wse1, wse2 = params
    N, C, T, V = x_nchw.shape
    hp = jax.lax.Precision.HIGHEST
    b1, s1, h1 = fcnv[0], fcnv[1], fcnv[2]
    bt, bv, s2, h2 = chv[0], chv[1], chv[2], chv[3]
    wt, wv = wtv[:, :C], wtv[:, C:]

    x = x_nchw.astype(jnp.float32)
    x_t = x.mean(axis=3)                               # (N, C, T)
    x_v = x.mean(axis=2)                               # (N, C, V)

    def fcn(y):                                        # (N, C, P) channel-major
        hh = jnp.einsum("ck,ncp->nkp", w1, y, precision=hp) + b1[None, :, None]
        return _hardswish(hh * s1[None, :, None] + h1[None, :, None])

    att_t = _sigmoid(jnp.einsum("kc,nkt->nct", wt, fcn(x_t), precision=hp)
                     + bt[None, :, None])              # (N, C, T)
    att_v = _sigmoid(jnp.einsum("kc,nkv->ncv", wv, fcn(x_v), precision=hp)
                     + bv[None, :, None])              # (N, C, V)
    x_att_ff = x * (att_t[:, :, :, None] * att_v[:, :, None, :])

    pool = x.mean(axis=(2, 3))                         # (N, C)
    z = jnp.maximum(jnp.dot(pool, wse1, precision=hp), 0.0)
    se = _sigmoid(jnp.dot(z, wse2, precision=hp))
    x_c_att = x * se[:, :, None, None]

    out = (x_att_ff + x_c_att) * s2[None, :, None, None] + h2[None, :, None, None]
    return _hardswish(out)


if __name__ == "__main__":
    # Skeleton-style input: 2 clips, 32 channels, 16 frames, 8 joints (T*V = 128).
    N, C, T, V = 2, 32, 16, 8
    reduct_ratio = 4

    key = jax.random.PRNGKey(0)
    kx, kp = jax.random.split(key)
    x = jax.random.normal(kx, (N, C, T, V), jnp.float32)
    params = make_params(kp, C, reduct_ratio)

    y = jax.block_until_ready(stc_att2(x, params))
    y_ref = jax.block_until_ready(stc_att2_reference(x, params))

    assert y.shape == (N, C, T, V), y.shape
    assert bool(jnp.all(jnp.isfinite(y)))
    max_err = float(jnp.max(jnp.abs(y - y_ref)))
    assert max_err < 2e-3, f"max |pallas - ref| = {max_err}"

    # bfloat16 activation I/O path (halves HBM traffic on v6e/v7x); compute f32.
    y_bf16 = jax.block_until_ready(stc_att2(x.astype(jnp.bfloat16), params))
    assert y_bf16.shape == (N, C, T, V) and y_bf16.dtype == jnp.bfloat16
    assert bool(jnp.all(jnp.isfinite(y_bf16.astype(jnp.float32))))

    print("KERNEL_OK")
</pallas_src>

<mosaic_0001>
module attributes {stable_mosaic.version = 11 : i64} {
  func.func @kernel(%arg0: i32, %arg1: memref<1x32x128xf32, #tpu.memory_space<vmem>>, %arg2: memref<128x24xf32, #tpu.memory_space<vmem>>, %arg3: memref<24x128xf32, #tpu.memory_space<vmem>>, %arg4: memref<32x8xf32, #tpu.memory_space<vmem>>, %arg5: memref<3x8xf32, #tpu.memory_space<vmem>>, %arg6: memref<8x64xf32, #tpu.memory_space<vmem>>, %arg7: memref<4x32xf32, #tpu.memory_space<vmem>>, %arg8: memref<32x2xf32, #tpu.memory_space<vmem>>, %arg9: memref<2x32xf32, #tpu.memory_space<vmem>>, %arg10: memref<1x32x128xf32, #tpu.memory_space<vmem>>) attributes {dimension_semantics = [#tpu.dimension_semantics<parallel>], iteration_bounds = array<i64: 2>, scalar_prefetch = 0 : i64, scratch_operands = 0 : i64, tpu.core_type = #tpu.core_type<tc>, window_params = [{transform_indices = @transform_0, window_bounds = array<i64: 1, 32, 128>}, {pipeline_mode = #tpu.pipeline_mode<synchronous>, transform_indices = @transform_1, window_bounds = array<i64: 128, 24>}, {pipeline_mode = #tpu.pipeline_mode<synchronous>, transform_indices = @transform_2, window_bounds = array<i64: 24, 128>}, {pipeline_mode = #tpu.pipeline_mode<synchronous>, transform_indices = @transform_3, window_bounds = array<i64: 32, 8>}, {pipeline_mode = #tpu.pipeline_mode<synchronous>, transform_indices = @transform_4, window_bounds = array<i64: 3, 8>}, {pipeline_mode = #tpu.pipeline_mode<synchronous>, transform_indices = @transform_5, window_bounds = array<i64: 8, 64>}, {pipeline_mode = #tpu.pipeline_mode<synchronous>, transform_indices = @transform_6, window_bounds = array<i64: 4, 32>}, {pipeline_mode = #tpu.pipeline_mode<synchronous>, transform_indices = @transform_7, window_bounds = array<i64: 32, 2>}, {pipeline_mode = #tpu.pipeline_mode<synchronous>, transform_indices = @transform_8, window_bounds = array<i64: 2, 32>}, {transform_indices = @transform_9, window_bounds = array<i64: 1, 32, 128>}]} {
    %c0 = arith.constant 0 : index
    %c0_0 = arith.constant 0 : index
    %c0_1 = arith.constant 0 : index
    %0 = vector.load %arg1[%c0, %c0_0, %c0_1] : memref<1x32x128xf32, #tpu.memory_space<vmem>>, vector<1x32x128xf32>
    %1 = vector.shape_cast %0 : vector<1x32x128xf32> to vector<32x128xf32>
    %c0_2 = arith.constant 0 : index
    %c0_3 = arith.constant 0 : index
    %2 = vector.load %arg2[%c0_2, %c0_3] : memref<128x24xf32, #tpu.memory_space<vmem>>, vector<128x24xf32>
    %cst = arith.constant dense<0.000000e+00> : vector<32x24xf32>
    %3 = tpu.matmul %1, %2, %cst {dimension_numbers = #tpu.dot_dimension_numbers<[1], [0], [0], [1], [0, 0, 1, 1], [], []>, precision = #tpu.contract_precision<fp32>} : vector<32x128xf32>, vector<128x24xf32>, vector<32x24xf32> -> vector<32x24xf32>
    %4 = tpu.transpose %3, [1, 0] : vector<32x24xf32> -> vector<24x32xf32>
    %c0_4 = arith.constant 0 : index
    %c0_5 = arith.constant 0 : index
    %5 = vector.load %arg5[%c0_4, %c0_5] : memref<3x8xf32, #tpu.memory_space<vmem>>, vector<3x8xf32>
    %6 = vector.extract_strided_slice %5 {offsets = [0, 0], sizes = [1, 8], strides = [1, 1]} : vector<3x8xf32> to vector<1x8xf32>
    %7 = vector.extract_strided_slice %5 {offsets = [1, 0], sizes = [1, 8], strides = [1, 1]} : vector<3x8xf32> to vector<1x8xf32>
    %8 = vector.extract_strided_slice %5 {offsets = [2, 0], sizes = [1, 8], strides = [1, 1]} : vector<3x8xf32> to vector<1x8xf32>
    %c0_6 = arith.constant 0 : index
    %c0_7 = arith.constant 0 : index
    %9 = vector.load %arg4[%c0_6, %c0_7] : memref<32x8xf32, #tpu.memory_space<vmem>>, vector<32x8xf32>
    %cst_8 = arith.constant dense<0.000000e+00> : vector<24x8xf32>
    %10 = tpu.matmul %4, %9, %cst_8 {dimension_numbers = #tpu.dot_dimension_numbers<[1], [0], [0], [1], [0, 0, 1, 1], [], []>, precision = #tpu.contract_precision<fp32>} : vector<24x32xf32>, vector<32x8xf32>, vector<24x8xf32> -> vector<24x8xf32>
    %11 = vector.broadcast %6 : vector<1x8xf32> to vector<24x8xf32>
    %12 = arith.addf %10, %11 : vector<24x8xf32>
    %13 = vector.broadcast %7 : vector<1x8xf32> to vector<24x8xf32>
    %14 = arith.mulf %12, %13 : vector<24x8xf32>
    %15 = vector.broadcast %8 : vector<1x8xf32> to vector<24x8xf32>
    %16 = arith.addf %14, %15 : vector<24x8xf32>
    %cst_9 = arith.constant 3.000000e+00 : f32
    %17 = vector.broadcast %cst_9 : f32 to vector<24x8xf32>
    %18 = arith.addf %16, %17 : vector<24x8xf32>
    %cst_10 = arith.constant 0.000000e+00 : f32
    %cst_11 = arith.constant 6.000000e+00 : f32
    %19 = vector.broadcast %cst_10 : f32 to vector<24x8xf32>
    %20 = arith.maximumf %19, %18 : vector<24x8xf32>
    %21 = vector.broadcast %cst_11 : f32 to vector<24x8xf32>
    %22 = arith.minimumf %21, %20 : vector<24x8xf32>
    %23 = arith.mulf %16, %22 : vector<24x8xf32>
    %cst_12 = arith.constant 0.166666672 : f32
    %24 = vector.broadcast %cst_12 : f32 to vector<24x8xf32>
    %25 = arith.mulf %23, %24 : vector<24x8xf32>
    %c0_13 = arith.constant 0 : index
    %c0_14 = arith.constant 0 : index
    %26 = vector.load %arg7[%c0_13, %c0_14] : memref<4x32xf32, #tpu.memory_space<vmem>>, vector<4x32xf32>
    %27 = vector.extract_strided_slice %26 {offsets = [0, 0], sizes = [1, 32], strides = [1, 1]} : vector<4x32xf32> to vector<1x32xf32>
    %28 = vector.extract_strided_slice %26 {offsets = [1, 0], sizes = [1, 32], strides = [1, 1]} : vector<4x32xf32> to vector<1x32xf32>
    %29 = vector.extract_strided_slice %26 {offsets = [2, 0], sizes = [1, 32], strides = [1, 1]} : vector<4x32xf32> to vector<1x32xf32>
    %30 = vector.extract_strided_slice %26 {offsets = [3, 0], sizes = [1, 32], strides = [1, 1]} : vector<4x32xf32> to vector<1x32xf32>
    %c0_15 = arith.constant 0 : index
    %c0_16 = arith.constant 0 : index
    %31 = vector.load %arg6[%c0_15, %c0_16] : memref<8x64xf32, #tpu.memory_space<vmem>>, vector<8x64xf32>
    %cst_17 = arith.constant dense<0.000000e+00> : vector<24x64xf32>
    %32 = tpu.matmul %25, %31, %cst_17 {dimension_numbers = #tpu.dot_dimension_numbers<[1], [0], [0], [1], [0, 0, 1, 1], [], []>, precision = #tpu.contract_precision<fp32>} : vector<24x8xf32>, vector<8x64xf32>, vector<24x64xf32> -> vector<24x64xf32>
    %33 = vector.extract_strided_slice %32 {offsets = [0, 0], sizes = [24, 32], strides = [1, 1]} : vector<24x64xf32> to vector<24x32xf32>
    %34 = vector.broadcast %27 : vector<1x32xf32> to vector<24x32xf32>
    %35 = arith.addf %33, %34 : vector<24x32xf32>
    %cst_18 = arith.constant 5.000000e-01 : f32
    %36 = vector.broadcast %cst_18 : f32 to vector<24x32xf32>
    %37 = arith.mulf %36, %35 : vector<24x32xf32>
    %38 = math.tanh %37 : vector<24x32xf32>
    %cst_19 = arith.constant 1.000000e+00 : f32
    %39 = vector.broadcast %cst_19 : f32 to vector<24x32xf32>
    %40 = arith.addf %38, %39 : vector<24x32xf32>
    %cst_20 = arith.constant 5.000000e-01 : f32
    %41 = vector.broadcast %cst_20 : f32 to vector<24x32xf32>
    %42 = arith.mulf %41, %40 : vector<24x32xf32>
    %43 = vector.broadcast %29 : vector<1x32xf32> to vector<24x32xf32>
    %44 = arith.mulf %42, %43 : vector<24x32xf32>
    %45 = vector.extract_strided_slice %32 {offsets = [0, 32], sizes = [24, 32], strides = [1, 1]} : vector<24x64xf32> to vector<24x32xf32>
    %46 = vector.broadcast %28 : vector<1x32xf32> to vector<24x32xf32>
    %47 = arith.addf %45, %46 : vector<24x32xf32>
    %cst_21 = arith.constant 5.000000e-01 : f32
    %48 = vector.broadcast %cst_21 : f32 to vector<24x32xf32>
    %49 = arith.mulf %48, %47 : vector<24x32xf32>
    %50 = math.tanh %49 : vector<24x32xf32>
    %cst_22 = arith.constant 1.000000e+00 : f32
    %51 = vector.broadcast %cst_22 : f32 to vector<24x32xf32>
    %52 = arith.addf %50, %51 : vector<24x32xf32>
    %cst_23 = arith.constant 5.000000e-01 : f32
    %53 = vector.broadcast %cst_23 : f32 to vector<24x32xf32>
    %54 = arith.mulf %53, %52 : vector<24x32xf32>
    %55 = tpu.iota {dimensions = array<i32: 1>} : vector<1x24xi32>
    %c16_i32 = arith.constant 16 : i32
    %56 = vector.broadcast %c16_i32 : i32 to vector<1x24xi32>
    %57 = arith.cmpi slt, %55, %56 : vector<1x24xi32>
    %58 = tpu.transpose %44, [1, 0] : vector<24x32xf32> -> vector<32x24xf32>
    %cst_24 = arith.constant 0.000000e+00 : f32
    %59 = vector.shape_cast %57 : vector<1x24xi1> to vector<1x24xi1>
    %60 = vector.broadcast %59 : vector<1x24xi1> to vector<32x24xi1>
    %61 = vector.broadcast %cst_24 : f32 to vector<32x24xf32>
    %62 = arith.select %60, %58, %61 : vector<32x24xi1>, vector<32x24xf32>
    %c16_i32_25 = arith.constant 16 : i32
    %63 = vector.broadcast %c16_i32_25 : i32 to vector<1x24xi32>
    %64 = arith.cmpi sge, %55, %63 : vector<1x24xi32>
    %65 = tpu.transpose %54, [1, 0] : vector<24x32xf32> -> vector<32x24xf32>
    %cst_26 = arith.constant 0.000000e+00 : f32
    %66 = vector.shape_cast %64 : vector<1x24xi1> to vector<1x24xi1>
    %67 = vector.broadcast %66 : vector<1x24xi1> to vector<32x24xi1>
    %68 = vector.broadcast %cst_26 : f32 to vector<32x24xf32>
    %69 = arith.select %67, %65, %68 : vector<32x24xi1>, vector<32x24xf32>
    %70 = tpu.iota {dimensions = array<i32: 1>} : vector<1x24x1xi32>
    %c16_i32_27 = arith.constant 16 : i32
    %71 = vector.broadcast %c16_i32_27 : i32 to vector<1x24x1xi32>
    %72 = arith.cmpi slt, %70, %71 : vector<1x24x1xi32>
    %73 = vector.shape_cast %4 : vector<24x32xf32> to vector<1x24x32xf32>
    %cst_28 = arith.constant 0.000000e+00 : f32
    %74 = vector.shape_cast %72 : vector<1x24x1xi1> to vector<1x24x1xi1>
    %75 = vector.broadcast %74 : vector<1x24x1xi1> to vector<1x24x32xi1>
    %76 = vector.broadcast %cst_28 : f32 to vector<1x24x32xf32>
    %77 = arith.select %75, %73, %76 : vector<1x24x32xi1>, vector<1x24x32xf32>
    %cst_29 = arith.constant dense<0.000000e+00> : vector<1x32xf32>
    %78 = vector.multi_reduction <add>, %77, %cst_29 [1] : vector<1x24x32xf32> to vector<1x32xf32>
    %cst_30 = arith.constant 6.250000e-02 : f32
    %79 = vector.broadcast %cst_30 : f32 to vector<1x32xf32>
    %80 = arith.mulf %78, %79 : vector<1x32xf32>
    %c0_31 = arith.constant 0 : index
    %c0_32 = arith.constant 0 : index
    %81 = vector.load %arg8[%c0_31, %c0_32] : memref<32x2xf32, #tpu.memory_space<vmem>>, vector<32x2xf32>
    %cst_33 = arith.constant dense<0.000000e+00> : vector<1x2xf32>
    %82 = tpu.matmul %80, %81, %cst_33 {dimension_numbers = #tpu.dot_dimension_numbers<[1], [0], [0], [1], [0, 0, 1, 1], [], []>, precision = #tpu.contract_precision<fp32>} : vector<1x32xf32>, vector<32x2xf32>, vector<1x2xf32> -> vector<1x2xf32>
    %cst_34 = arith.constant 0.000000e+00 : f32
    %83 = vector.broadcast %cst_34 : f32 to vector<1x2xf32>
    %84 = arith.maximumf %82, %83 : vector<1x2xf32>
    %c0_35 = arith.constant 0 : index
    %c0_36 = arith.constant 0 : index
    %85 = vector.load %arg9[%c0_35, %c0_36] : memref<2x32xf32, #tpu.memory_space<vmem>>, vector<2x32xf32>
    %cst_37 = arith.constant dense<0.000000e+00> : vector<1x32xf32>
    %86 = tpu.matmul %84, %85, %cst_37 {dimension_numbers = #tpu.dot_dimension_numbers<[1], [0], [0], [1], [0, 0, 1, 1], [], []>, precision = #tpu.contract_precision<fp32>} : vector<1x2xf32>, vector<2x32xf32>, vector<1x32xf32> -> vector<1x32xf32>
    %cst_38 = arith.constant 5.000000e-01 : f32
    %87 = vector.broadcast %cst_38 : f32 to vector<1x32xf32>
    %88 = arith.mulf %87, %86 : vector<1x32xf32>
    %89 = math.tanh %88 : vector<1x32xf32>
    %cst_39 = arith.constant 1.000000e+00 : f32
    %90 = vector.broadcast %cst_39 : f32 to vector<1x32xf32>
    %91 = arith.addf %89, %90 : vector<1x32xf32>
    %cst_40 = arith.constant 5.000000e-01 : f32
    %92 = vector.broadcast %cst_40 : f32 to vector<1x32xf32>
    %93 = arith.mulf %92, %91 : vector<1x32xf32>
    %94 = arith.mulf %93, %29 : vector<1x32xf32>
    %c0_41 = arith.constant 0 : index
    %c0_42 = arith.constant 0 : index
    %95 = vector.load %arg3[%c0_41, %c0_42] : memref<24x128xf32, #tpu.memory_space<vmem>>, vector<24x128xf32>
    %cst_43 = arith.constant dense<0.000000e+00> : vector<32x128xf32>
    %96 = tpu.matmul %62, %95, %cst_43 {dimension_numbers = #tpu.dot_dimension_numbers<[1], [0], [0], [1], [0, 0, 1, 1], [], []>, precision = #tpu.contract_precision<fp32>} : vector<32x24xf32>, vector<24x128xf32>, vector<32x128xf32> -> vector<32x128xf32>
    %97 = vector.shape_cast %96 : vector<32x128xf32> to vector<1x32x128xf32>
    %cst_44 = arith.constant dense<0.000000e+00> : vector<32x128xf32>
    %98 = tpu.matmul %69, %95, %cst_44 {dimension_numbers = #tpu.dot_dimension_numbers<[1], [0], [0], [1], [0, 0, 1, 1], [], []>, precision = #tpu.contract_precision<fp32>} : vector<32x24xf32>, vector<24x128xf32>, vector<32x128xf32> -> vector<32x128xf32>
    %99 = vector.shape_cast %98 : vector<32x128xf32> to vector<1x32x128xf32>
    %100 = arith.mulf %97, %99 : vector<1x32x128xf32>
    %101 = vector.shape_cast %94 : vector<1x32xf32> to vector<1x32x1xf32>
    %102 = vector.broadcast %101 : vector<1x32x1xf32> to vector<1x32x128xf32>
    %103 = arith.addf %100, %102 : vector<1x32x128xf32>
    %104 = arith.mulf %0, %103 : vector<1x32x128xf32>
    %105 = vector.shape_cast %30 : vector<1x32xf32> to vector<1x32x1xf32>
    %106 = vector.broadcast %105 : vector<1x32x1xf32> to vector<1x32x128xf32>
    %107 = arith.addf %104, %106 : vector<1x32x128xf32>
    %cst_45 = arith.constant 3.000000e+00 : f32
    %108 = vector.broadcast %cst_45 : f32 to vector<1x32x128xf32>
    %109 = arith.addf %107, %108 : vector<1x32x128xf32>
    %cst_46 = arith.constant 0.000000e+00 : f32
    %cst_47 = arith.constant 6.000000e+00 : f32
    %110 = vector.broadcast %cst_46 : f32 to vector<1x32x128xf32>
    %111 = arith.maximumf %110, %109 : vector<1x32x128xf32>
    %112 = vector.broadcast %cst_47 : f32 to vector<1x32x128xf32>
    %113 = arith.minimumf %112, %111 : vector<1x32x128xf32>
    %114 = arith.mulf %107, %113 : vector<1x32x128xf32>
    %cst_48 = arith.constant 0.166666672 : f32
    %115 = vector.broadcast %cst_48 : f32 to vector<1x32x128xf32>
    %116 = arith.mulf %114, %115 : vector<1x32x128xf32>
    %c0_49 = arith.constant 0 : index
    %c0_50 = arith.constant 0 : index
    %c0_51 = arith.constant 0 : index
    %117 = vector.load %arg10[%c0_49, %c0_50, %c0_51] : memref<1x32x128xf32, #tpu.memory_space<vmem>>, vector<1x32x128xf32>
    tpu.vector_store %arg10[%c0_49, %c0_50, %c0_51], %116 {strides = array<i32>} : memref<1x32x128xf32, #tpu.memory_space<vmem>>, vector<1x32x128xf32>,
    return
  }
  func.func @transform_0(%arg0: i32) -> (i32, i32, i32) {
    %c0_i32 = arith.constant 0 : i32
    %c0_i32_0 = arith.constant 0 : i32
    %c0_i32_1 = arith.constant 0 : i32
    return %arg0, %c0_i32, %c0_i32_0 : i32, i32, i32
  }
  func.func @transform_1(%arg0: i32) -> (i32, i32) {
    %c0_i32 = arith.constant 0 : i32
    %c0_i32_0 = arith.constant 0 : i32
    %c0_i32_1 = arith.constant 0 : i32
    return %c0_i32, %c0_i32_0 : i32, i32
  }
  func.func @transform_2(%arg0: i32) -> (i32, i32) {
    %c0_i32 = arith.constant 0 : i32
    %c0_i32_0 = arith.constant 0 : i32
    %c0_i32_1 = arith.constant 0 : i32
    return %c0_i32, %c0_i32_0 : i32, i32
  }
  func.func @transform_3(%arg0: i32) -> (i32, i32) {
    %c0_i32 = arith.constant 0 : i32
    %c0_i32_0 = arith.constant 0 : i32
    %c0_i32_1 = arith.constant 0 : i32
    return %c0_i32, %c0_i32_0 : i32, i32
  }
  func.func @transform_4(%arg0: i32) -> (i32, i32) {
    %c0_i32 = arith.constant 0 : i32
    %c0_i32_0 = arith.constant 0 : i32
    %c0_i32_1 = arith.constant 0 : i32
    return %c0_i32, %c0_i32_0 : i32, i32
  }
  func.func @transform_5(%arg0: i32) -> (i32, i32) {
    %c0_i32 = arith.constant 0 : i32
    %c0_i32_0 = arith.constant 0 : i32
    %c0_i32_1 = arith.constant 0 : i32
    return %c0_i32, %c0_i32_0 : i32, i32
  }
  func.func @transform_6(%arg0: i32) -> (i32, i32) {
    %c0_i32 = arith.constant 0 : i32
    %c0_i32_0 = arith.constant 0 : i32
    %c0_i32_1 = arith.constant 0 : i32
    return %c0_i32, %c0_i32_0 : i32, i32
  }
  func.func @transform_7(%arg0: i32) -> (i32, i32) {
    %c0_i32 = arith.constant 0 : i32
    %c0_i32_0 = arith.constant 0 : i32
    %c0_i32_1 = arith.constant 0 : i32
    return %c0_i32, %c0_i32_0 : i32, i32
  }
  func.func @transform_8(%arg0: i32) -> (i32, i32) {
    %c0_i32 = arith.constant 0 : i32
    %c0_i32_0 = arith.constant 0 : i32
    %c0_i32_1 = arith.constant 0 : i32
    return %c0_i32, %c0_i32_0 : i32, i32
  }
  func.func @transform_9(%arg0: i32) -> (i32, i32, i32) {
    %c0_i32 = arith.constant 0 : i32
    %c0_i32_0 = arith.constant 0 : i32
    %c0_i32_1 = arith.constant 0 : i32
    return %arg0, %c0_i32, %c0_i32_0 : i32, i32, i32
  }
}

</mosaic_0001>

<bundles_post_ra>
// kernel: tpu_custom_call.1
= control target key start
LH: loop header
LB: loop body
LE: loop exit
PB: predicated region body
PF: predicated region fallthrough
CT: control target
= control target key end

     0   :  { %14 = vsyncpa [#allocation3], 0  ;;  %s3465_s0 = inlined_call_operand.vmem [shape: f32[2,32,128], index: 0, kind: input, shape index: {}]   ;;  %s3466_s1 = inlined_call_operand.vmem [shape: f32[128,24], index: 1, kind: input, shape index: {}]   ;;  %s3467_s2 = inlined_call_operand.vmem [shape: f32[24,128], index: 2, kind: input, shape index: {}]   ;;  %s3468_s3 = inlined_call_operand.vmem [shape: f32[32,8], index: 3, kind: input, shape index: {}]   ;;  %s3469_s4 = inlined_call_operand.vmem [shape: f32[3,8], index: 4, kind: input, shape index: {}]   ;;  %s3470_s5 = inlined_call_operand.vmem [shape: f32[8,64], index: 5, kind: input, shape index: {}]   ;;  %s3471_s6 = inlined_call_operand.vmem [shape: f32[4,32], index: 6, kind: input, shape index: {}]   ;;  %s3472_s7 = inlined_call_operand.vmem [shape: f32[32,2], index: 7, kind: input, shape index: {}]   ;;  %s3473_s8 = inlined_call_operand.vmem [shape: f32[2,32], index: 8, kind: input, shape index: {}]   ;;  %s3474_s9 = inlined_call_operand.hbm [shape: f32[2,32,128], index: 9, kind: output, shape index: {}]  }
   0x1   :  { %16 = vsyncpa [#allocation3 + $0x1], 0  ;;  %s2766_s30 = smov 0   ;;  %s2768_s10 = smov 0  }
   0x2   :  { %s2770_s11 = smov 0   ;;  %s2772_s12 = smov 0  }
   0x3 LB: > { %s2787_s13 = sadd.s32 4294967295, %s2710_s12   ;;  %s2565_s14 = sadd.s32 4294967294, %s2710_s12   ;;  %s2710_s12 = sphi %s2772_s12, %s3486_s12   ;;  %s2706_s11 = sphi %s2770_s11, %s3485_s11   ;;  %s2702_s10 = sphi %s2768_s10, %s3484_s10   ;;  %s2698_s30 = sphi %s2766_s30, %s3483_s30  }
   0x4   : > { %s2791_s15 = sadd.s32 1, %s2710_s12   ;;  %s223_s16 = sadd.s32 1, %s2706_s11 }
   0x5   : > { %s220_s17 = ssub.s32 %s2710_s12, %s2791_s15  ;;  %p233_p0 = scmp.ne.s32.totalorder %s2706_s11, %s2702_s10 }
   0x6   : > { %p221_p1 = scmp.eq.s32.totalorder %s220_s17, 0  ;;  %p234_p2 = scmp.eq.s32.totalorder %s2787_s13, 1 }
   0x7   : > { %p239_p3 = scmp.ne.s32.totalorder %s2702_s10, %s2698_s30  ;;  %p240_p4 = scmp.eq.s32.totalorder %s2565_s14, 1 }
   0x8   : > { %s2802_s18 = scalar_select %p221_p1, %s2706_s11, %s223_s16  }
   0x9   : > { %p2804_p5 = por %p234_p2, %p233_p0  ;;  %p2808_p6 = por %p240_p4, %p239_p3 }
   0xa   : > { %p2568_p7 = scmp.ge.s32.totalorder %s2710_s12, 1  ;;  %p290_p8 = scmp.lt.s32.totalorder %s2710_s12, 3 }
   0xc   : > { %p291_p9 = pnand %p2568_p7, %p290_p8 }
   0xd   : > { %p326_p10 = scmp.lt.s32.totalorder (!%p291_p9), %s2787_s13, 1  ;;  %s2712_s22 = smov (!%p291_p9), 32  }
   0xe   : > { %294 = sbr.rel (%p291_p9) target bundleno = 1256 (0x4e8), region = 56  ;;  %s2713_s26 = smov (!%p291_p9), 96  }
   0xf   : > { %s323_s21 = sand.u32 (!%p291_p9), 1, %s2702_s10   ;;  %s2578_s24 = sshll.u32 (!%p291_p9), %s2787_s13, 5 }
  0x10   : > { %s2499_s28 = scalar_lea.hbm (!%p291_p9), %s3474_s9, %s2578_s24  ;;  %s2668_s24 = scalar_lea.hbm (!%p291_p9), %s3474_s9, 64 }
  0x11   : > { %s2502_s14 = sshll.u32 (!%p291_p9), %s2499_s28, 4  ;;  %s2503_s14 = int_to_ptr.hbm [resolvable:$true] %s2502_s14 }
  0x13   : > { %v350_v0 = vld [vmem:[%s3466_s1 + $0x78] sm:$0xff]  ;;  %v349_v1 = vld [vmem:[%s3466_s1 + $0x70] sm:$0xff]  ;;  %v348_v2 = vld [vmem:[%s3466_s1 + $0x68] sm:$0xff]  ;;  %s2881_s27 = scalar_select %p326_p10, %s2787_s13, 1  ;;  %vm823_vm0 = vcmask 261120   ;;  %vm1105_vm1 = vcmask 64512  }
  0x14   : > { %v2824_v3 = vand.u32 4294901760, %v350_v0  ;;  %v2826_v4 = vand.u32 4294901760, %v349_v1  ;;  %v2828_v5 = vand.u32 4294901760, %v348_v2  ;;  %v347_v6 = vld [vmem:[%s3466_s1 + $0x60] sm:$0xff]  ;;  %v346_v7 = vld [vmem:[%s3466_s1 + $0x58] sm:$0xff]  ;;  %v345_v8 = vld [vmem:[%s3466_s1 + $0x50] sm:$0xff] }
  0x15   : > { %v2839_v9 = vand.u32 4294901760, %v347_v6  ;;  %v2841_v10 = vand.u32 4294901760, %v346_v7  ;;  %v2843_v11 = vand.u32 4294901760, %v345_v8  ;;  %v344_v12 = vld [vmem:[%s3466_s1 + $0x48] sm:$0xff]  ;;  %v343_v13 = vld [vmem:[%s3466_s1 + $0x40] sm:$0xff]  ;;  %v342_v18 = vld [vmem:[%s3466_s1 + $0x38] sm:$0xff] }
  0x16   : > { %352 = vmatpush.msra.mxu0 %v2824_v3  ;;  %v2853_v14 = vsub.f32 %v350_v0, %v2824_v3  ;;  %v2856_v15 = vsub.f32 %v349_v1, %v2826_v4  ;;  %599 = vmatpush.msra.mxu3 %v2824_v3  ;;  %v2860_v16 = vsub.f32 %v348_v2, %v2828_v5  ;;  %v2862_v17 = vand.u32 4294901760, %v344_v12  ;;  %v341_v29 = vld [vmem:[%s3466_s1 + $0x30] sm:$0xff]  ;;  %v340_v36 = vld [vmem:[%s3466_s1 + $0x28] sm:$0xff]  ;;  %s2577_s17 = sshll.u32 %s2881_s27, 5  ;;  %v339_v43 = vld [vmem:[%s3466_s1 + $0x20] sm:$0xff]  ;;  %s2662_s13 = sshra.s32 %s2503_s14, 4  ;;  %s2663_s13 = int_to_ptr.hbm [resolvable:$true] %s2662_s13 }
  0x17   : > { %v2868_v19 = vsub.f32 %v347_v6, %v2839_v9  ;;  %v2871_v20 = vsub.f32 %v346_v7, %v2841_v10  ;;  %v2873_v21 = vand.u32 4294901760, %v343_v13  ;;  %v2876_v22 = vsub.f32 %v345_v8, %v2843_v11  ;;  %s2943_s25 = scalar_lea.vmem %s3465_s0, %s2577_s17  ;;  %v338_v49 = vld [vmem:[%s3466_s1 + $0x18] sm:$0xff]  ;;  %v337_v55 = vld [vmem:[%s3466_s1 + $0x10] sm:$0xff]  ;;  %v336_v62 = vld [vmem:[%s3466_s1 + $0x8] sm:$0xff]  ;;  %s2664_s16 = scalar_lea.hbm %s2663_s13, 32 }
  0x18   : > { %354 = vmatpush.msra.mxu0 %v2826_v4  ;;  %531 = vmatpush.msra.mxu2 %v2853_v14  ;;  %v418_v23 = vand.u32 4294901760, %v2853_v14  ;;  %v424_v24 = vand.u32 4294901760, %v2856_v15  ;;  %v430_v25 = vand.u32 4294901760, %v2860_v16  ;;  %v2890_v27 = vand.u32 4294901760, %v342_v18  ;;  %v331_v56 = vld [vmem:[%s2943_s25] sm:$0xff]  ;;  %p2665_p11 = scmp.ne.s32.totalorder %s2663_s13, %s2664_s16  ;;  %p2669_p0 = scmp.lt.s32.totalorder %s2663_s13, %s3474_s9 }
  0x19   : > { %601 = vmatpush.msra.mxu3 %v2826_v4  ;;  %v436_v26 = vand.u32 4294901760, %v2868_v19  ;;  %v2893_v28 = vsub.f32 %v344_v12, %v2862_v17  ;;  %v442_v33 = vand.u32 4294901760, %v2871_v20  ;;  %v448_v34 = vand.u32 4294901760, %v2876_v22  ;;  %v335_v8 = vld [vmem:[%s3466_s1] sm:$0xff]  ;;  %p2670_p1 = scmp.lt.s32.totalorder %s2668_s24, %s2664_s16 }
  0x1a   : > { %356 = vmatpush.msra.mxu0 %v2828_v5  ;;  %534 = vmatpush.msra.mxu2 %v2856_v15  ;;  %v419_v30 = vsub.f32 %v2853_v14, %v418_v23  ;;  %v425_v31 = vsub.f32 %v2856_v15, %v424_v24  ;;  %v431_v32 = vsub.f32 %v2860_v16, %v430_v25  ;;  %v2924_v40 = vand.u32 4294901760, %v341_v29  ;;  %p2666_p12 = pnand %p2665_p11, %p2804_p5 }
  0x1b   : > { %603 = vmatpush.msra.mxu3 %v2828_v5  ;;  %v2913_v35 = vsub.f32 %v343_v13, %v2873_v21  ;;  %v437_v39 = vsub.f32 %v2868_v19, %v436_v26  ;;  %v454_v41 = vand.u32 4294901760, %v2893_v28  ;;  %v2929_v42 = vsub.f32 %v342_v18, %v2890_v27  ;;  %p2671_p2 = por %p2670_p1, %p2669_p0 }
  0x1c   : > { %358 = vmatpush.msra.mxu0 %v2839_v9  ;;  %v420_v37 = vand.u32 4294901760, %v419_v30  ;;  %537 = vmatpush.msra.mxu2 %v2860_v16  ;;  %v426_v38 = vand.u32 4294901760, %v425_v31  ;;  %v432_v44 = vand.u32 4294901760, %v431_v32  ;;  %v443_v45 = vsub.f32 %v2871_v20, %v442_v33  ;;  %v332_v30 = vld [vmem:[%s2943_s25 + $0x8] sm:$0xff]  ;;  %p2667_p13 = pneg %p2666_p12 }
  0x1d   : > { %605 = vmatpush.msra.mxu3 %v2839_v9  ;;  %v2938_v46 = vand.u32 4294901760, %v340_v36  ;;  %v449_v47 = vsub.f32 %v2876_v22, %v448_v34  ;;  %v460_v48 = vand.u32 4294901760, %v2913_v35  ;;  %v438_v50 = vand.u32 4294901760, %v437_v39 }
  0x1e   : > { %360 = vmatpush.msra.mxu0 %v2841_v10  ;;  %421 = vmatpush.msra.mxu1 %v420_v37  ;;  %v2955_v51 = vand.u32 4294901760, %v339_v43  ;;  %v2958_v52 = vsub.f32 %v341_v29, %v2924_v40  ;;  %v455_v53 = vsub.f32 %v2893_v28, %v454_v41  ;;  %v466_v54 = vand.u32 4294901760, %v2929_v42  ;;  %p2672_p3 = pnand %p2671_p2, %p2667_p13 }
  0x1f   : > { %540 = vmatpush.msra.mxu2 %v2868_v19  ;;  %607 = vmatpush.msra.mxu3 %v2841_v10  ;;  %v444_v57 = vand.u32 4294901760, %v443_v45  ;;  %v2971_v58 = vand.u32 4294901760, %v338_v49  ;;  %v2974_v59 = vsub.f32 %v340_v36, %v2938_v46  ;;  %v450_v60 = vand.u32 4294901760, %v449_v47 }
  0x20   : > { %362 = vmatpush.msra.mxu0 %v2843_v11  ;;  %427 = vmatpush.msra.mxu1 %v426_v38  ;;  %v461_v61 = vsub.f32 %v2913_v35, %v460_v48  ;;  %v2985_v63 = vand.u32 4294901760, %v337_v55  ;;  %v472_v0 = vand.u32 4294901760, %v2958_v52  ;;  %v2989_v1 = vsub.f32 %v339_v43, %v2955_v51 }
  0x21   : > { %543 = vmatpush.msra.mxu2 %v2871_v20  ;;  %609 = vmatpush.msra.mxu3 %v2843_v11  ;;  %v2991_v2 = vand.u32 4294901760, %v331_v56  ;;  %v456_v6 = vand.u32 4294901760, %v455_v53  ;;  %v467_v7 = vsub.f32 %v2929_v42, %v466_v54  ;;  %v3002_v12 = vand.u32 4294901760, %v336_v62 }
  0x22   : > { %364 = vmatpush.msra.mxu0 %v2862_v17  ;;  %433 = vmatpush.msra.mxu1 %v432_v44  ;;  %v478_v13 = vand.u32 4294901760, %v2974_v59  ;;  %v3006_v18 = vsub.f32 %v338_v49, %v2971_v58  ;;  %v462_v31 = vand.u32 4294901760, %v461_v61  ;;  %v473_v32 = vsub.f32 %v2958_v52, %v472_v0 }
  0x23   : > { %546 = vmatpush.msra.mxu2 %v2876_v22  ;;  %611 = vmatpush.msra.mxu3 %v2862_v17  ;;  %v3009_v29 = vsub.f32 %v331_v56, %v2991_v2  ;;  %v3018_v36 = vand.u32 4294901760, %v335_v8  ;;  %v484_v37 = vand.u32 4294901760, %v2989_v1  ;;  %v3022_v38 = vsub.f32 %v337_v55, %v2985_v63 }
  0x24   : > { %366 = vmatpush.msra.mxu0 %v2873_v21  ;;  %439 = vmatpush.msra.mxu1 %v438_v50  ;;  %v3027_v43 = vand.u32 4294901760, %v332_v30  ;;  %v468_v44 = vand.u32 4294901760, %v467_v7  ;;  %v479_v45 = vsub.f32 %v2974_v59, %v478_v13  ;;  %v3477_v47 = vand.u32 4294901760, %v3006_v18  ;;  %v333_v7 = vld [vmem:[%s2943_s25 + $0x10] sm:$0xff] }
  0x25   : > { %549 = vmatpush.msra.mxu2 %v2893_v28  ;;  %613 = vmatpush.msra.mxu3 %v2873_v21  ;;  %v385_v39 = vand.u32 4294901760, %v3009_v29  ;;  %v3035_v49 = vsub.f32 %v336_v62, %v3002_v12  ;;  %v474_v50 = vand.u32 4294901760, %v473_v32  ;;  %v485_v53 = vsub.f32 %v2989_v1, %v484_v37 }
  0x26   : > { %368 = vmatpush.msra.mxu0 %v2890_v27  ;;  %445 = vmatpush.msra.mxu1 %v444_v57  ;;  %v3475_v55 = vand.u32 4294901760, %v3022_v38  ;;  %v3045_v56 = vsub.f32 %v335_v8, %v3018_v36  ;;  %v480_v61 = vand.u32 4294901760, %v479_v45  ;;  %v491_v62 = vsub.f32 %v3006_v18, %v3477_v47  ;;  %v334_v47 = vld [vmem:[%s2943_s25 + $0x18] sm:$0xff] }
  0x27   : > { %552 = vmatpush.msra.mxu2 %v2913_v35  ;;  %615 = vmatpush.msra.mxu3 %v2890_v27  ;;  %v386_v57 = vsub.f32 %v3009_v29, %v385_v39  ;;  %v486_v8 = vand.u32 4294901760, %v485_v53  ;;  %v3066_v45 = vand.u32 4294901760, %v333_v7  ;;  %vm1681_vm2 = vcmask 1041408  }
  0x28   : > { %370 = vmatpush.msra.mxu0 %v2924_v40  ;;  %451 = vmatpush.msra.mxu1 %v450_v60  ;;  %v392_v60 = vsub.f32 %v332_v30, %v3027_v43  ;;  %v497_v30 = vsub.f32 %v3022_v38, %v3475_v55  ;;  %vm1677_vm3 = vcmask 15360   ;;  %vm1842_vm5 = vcmask 195584  }
  0x29   : > { %555 = vmatpush.msra.mxu2 %v2929_v42  ;;  %617 = vmatpush.msra.mxu3 %v2924_v40  ;;  %v387_v32 = vand.u32 4294901760, %v386_v57  ;;  %v819_v42 = vld [vmem:[%s3468_s3 + $0x8] sm:$0xff] }
  0x2a   : > { %372 = vmatpush.msra.mxu0 %v2938_v46  ;;  %457 = vmatpush.msra.mxu1 %v456_v6  ;;  %v3476_v6 = vand.u32 4294901760, %v3035_v49  ;;  %v498_v57 = vand.u32 4294901760, %v497_v30 }
  0x2b   : > { %558 = vmatpush.msra.mxu2 %v2958_v52  ;;  %619 = vmatpush.msra.mxu3 %v2938_v46 }
  0x2c   : > { %374 = vmatpush.msra.mxu0 %v2955_v51  ;;  %463 = vmatpush.msra.mxu1 %v462_v31  ;;  %v508_v31 = vand.u32 4294901760, %v3045_v56  ;;  %v503_v53 = vsub.f32 %v3035_v49, %v3476_v6 }
  0x2d   : > { %561 = vmatpush.msra.mxu2 %v2974_v59  ;;  %621 = vmatpush.msra.mxu3 %v2955_v51 }
  0x2e   : > { %376 = vmatpush.msra.mxu0 %v2971_v58  ;;  %469 = vmatpush.msra.mxu1 %v468_v44  ;;  %v393_v44 = vand.u32 4294901760, %v392_v60  ;;  %v509_v55 = vsub.f32 %v3045_v56, %v508_v31  ;;  %v504_v6 = vand.u32 4294901760, %v503_v53 }
  0x2f   : > { %564 = vmatpush.msra.mxu2 %v2989_v1  ;;  %623 = vmatpush.msra.mxu3 %v2971_v58 }
  0x30   : > { %378 = vmatpush.msra.mxu0 %v2985_v63  ;;  %475 = vmatpush.msra.mxu1 %v474_v50  ;;  %v492_v50 = vand.u32 4294901760, %v491_v62  ;;  %v400_v62 = vsub.f32 %v333_v7, %v3066_v45 }
  0x31   : > { %567 = vmatpush.msra.mxu2 %v3006_v18  ;;  %625 = vmatpush.msra.mxu3 %v2985_v63 }
  0x32   : > { %380 = vmatpush.msra.mxu0 %v3002_v12  ;;  %481 = vmatpush.msra.mxu1 %v480_v61  ;;  %v394_v61 = vsub.f32 %v392_v60, %v393_v44  ;;  %v401_v7 = vand.u32 4294901760, %v400_v62 }
  0x33   : > { %570 = vmatpush.msra.mxu2 %v3022_v38  ;;  %627 = vmatpush.msra.mxu3 %v3002_v12 }
  0x34   : > { %382 = vmatpush.msra.mxu0 %v3018_v36  ;;  %487 = vmatpush.msra.mxu1 %v486_v8  ;;  %v510_v8 = vand.u32 4294901760, %v509_v55  ;;  %v395_v30 = vand.u32 4294901760, %v394_v61  ;;  %v402_v14 = vsub.f32 %v400_v62, %v401_v7 }
  0x35   : > { %388 = vmatmul.f32.vlgmr.msra.gmra.mxu0 %v387_v32  ;;  %573 = vmatpush.msra.mxu2 %v3035_v49  ;;  %v407_v32 = vand.u32 4294901760, %v334_v47 }
  0x36   : > { %493 = vmatpush.msra.mxu1 %v492_v50  ;;  %658 = vmatpush.msrb.mxu0 %v418_v23  ;;  %v403_v16 = vand.u32 4294901760, %v402_v14 }
  0x37   : > { %576 = vmatpush.msra.mxu2 %v3045_v56  ;;  %629 = vmatpush.msra.mxu3 %v3018_v36  ;;  %v408_v15 = vsub.f32 %v334_v47, %v407_v32 }
  0x38   : > { %499 = vmatpush.msra.mxu1 %v498_v57  ;;  %662 = vmatpush.msrb.mxu0 %v424_v24 }
  0x39   : > { %579 = vmatmul.f32.vlgmr.msra.gmra.mxu2 %v3009_v29  ;;  %633 = vmatmul.f32.vlgmr.msra.gmra.mxu3 %v385_v39  ;;  %v409_v19 = vand.u32 4294901760, %v408_v15 }
  0x3a   : > { %505 = vmatpush.msra.mxu1 %v504_v6  ;;  %666 = vmatpush.msrb.mxu0 %v430_v25 }
  0x3c   : > { %511 = vmatpush.msra.mxu1 %v510_v8  ;;  %670 = vmatpush.msrb.mxu0 %v436_v26 }
  0x3d   : > { %396 = vmatmul.f32.gmra.mxu0 %v395_v30  ;;  %513 = vmatmul.f32.vlgmr.msra.gmra.mxu1 %v2991_v2 }
  0x3e   : > { %737 = vmatpush.msrb.mxu1 %v2824_v3  ;;  %674 = vmatpush.msrb.mxu0 %v442_v33  ;;  %v410_v3 = vsub.f32 %v408_v15, %v409_v19 }
  0x40   : > { %739 = vmatpush.msrb.mxu1 %v2826_v4  ;;  %678 = vmatpush.msrb.mxu0 %v448_v34  ;;  %v411_v4 = vand.u32 4294901760, %v410_v3 }
  0x41   : > { %584 = vmatmul.f32.gmra.mxu2 %v392_v60  ;;  %639 = vmatmul.f32.gmra.mxu3 %v393_v44 }
  0x42   : > { %741 = vmatpush.msrb.mxu1 %v2828_v5  ;;  %682 = vmatpush.msrb.mxu0 %v454_v41  ;;  %v3480_v5 = vand.u32 4294901760, %v3006_v18  ;;  %v820_v41 = vld [vmem:[%s3468_s3 + $0x10] sm:$0xff] }
  0x44   : > { %743 = vmatpush.msrb.mxu1 %v2839_v9  ;;  %686 = vmatpush.msrb.mxu0 %v460_v48  ;;  %v3481_v9 = vand.u32 4294901760, %v3022_v38  ;;  %v3152_v48 = vand.u32 4294901760, %v820_v41 }
  0x45   : > { %404 = vmatmul.f32.gmra.mxu0 %v403_v16  ;;  %517 = vmatmul.f32.gmra.mxu1 %v3027_v43 }
  0x46   : > { %745 = vmatpush.msrb.mxu1 %v2841_v10  ;;  %690 = vmatpush.msrb.mxu0 %v466_v54  ;;  %v3482_v10 = vand.u32 4294901760, %v3035_v49 }
  0x48   : > { %747 = vmatpush.msrb.mxu1 %v2843_v11  ;;  %694 = vmatpush.msrb.mxu0 %v472_v0 }
  0x49   : > { %589 = vmatmul.f32.gmra.mxu2 %v400_v62  ;;  %645 = vmatmul.f32.gmra.mxu3 %v401_v7 }
  0x4a   : > { %749 = vmatpush.msrb.mxu1 %v2862_v17  ;;  %698 = vmatpush.msrb.mxu0 %v478_v13 }
  0x4c   : > { %751 = vmatpush.msrb.mxu1 %v2873_v21  ;;  %702 = vmatpush.msrb.mxu0 %v484_v37 }
  0x4d   : > { %412 = vmatmul.f32.gmra.mxu0 %v411_v4  ;;  %521 = vmatmul.f32.gmra.mxu1 %v3066_v45 }
  0x4e   : > { %753 = vmatpush.msrb.mxu1 %v2890_v27  ;;  %706 = vmatpush.msrb.mxu0 %v3480_v5 }
  0x50   : > { %755 = vmatpush.msrb.mxu1 %v2924_v40  ;;  %710 = vmatpush.msrb.mxu0 %v3481_v9  ;;  %v821_v40 = vld [vmem:[%s3468_s3 + $0x18] sm:$0xff]  ;;  %v818_v9 = vld [vmem:[%s3468_s3] sm:$0xff] }
  0x51   : > { %594 = vmatmul.f32.gmra.mxu2 %v408_v15  ;;  %651 = vmatmul.f32.gmra.mxu3 %v409_v19 }
  0x52   : > { %757 = vmatpush.msrb.mxu1 %v2938_v46  ;;  %714 = vmatpush.msrb.mxu0 %v3482_v10  ;;  %v3150_v46 = vand.u32 4294901760, %v821_v40  ;;  %v851_v10 = vand.u32 4294901760, %v818_v9 }
  0x54   : > { %759 = vmatpush.msrb.mxu1 %v2955_v51  ;;  %718 = vmatpush.msrb.mxu0 %v508_v31  ;;  %v3154_v51 = vand.u32 4294901760, %v819_v42  ;;  %v891_v59 = vsub.f32 %v821_v40, %v3150_v46 }
  0x55   : > { %525 = vmatmul.f32.gmra.mxu1 %v407_v32  ;;  %720 = vmatmul.f32.vlgmr.msrb.gmra.mxu0 %v2991_v2 }
  0x56   : > { %761 = vmatpush.msrb.mxu1 %v2971_v58  ;;  %846 = vmatpush.msrb.mxu2 %v3150_v46  ;;  %v903_v0 = vsub.f32 %v819_v42, %v3154_v51  ;;  %v892_v13 = vand.u32 4294901760, %v891_v59 }
  0x58   : > { %763 = vmatpush.msrb.mxu1 %v2985_v63  ;;  %v897_v63 = vsub.f32 %v820_v41, %v3152_v48  ;;  %848 = vmatpush.msrb.mxu2 %v3152_v48  ;;  %v904_v29 = vand.u32 4294901760, %v903_v0  ;;  %v893_v38 = vsub.f32 %v891_v59, %v892_v13 }
  0x59   : > { %1021 = vmatpush.msra.mxu0 %v892_v13 }
  0x5a   : > { %765 = vmatpush.msrb.mxu1 %v3002_v12  ;;  %v898_v18 = vand.u32 4294901760, %v897_v63  ;;  %850 = vmatpush.msrb.mxu2 %v3154_v51  ;;  %v894_v49 = vand.u32 4294901760, %v893_v38 }
  0x5c   : > { %767 = vmatpush.msrb.mxu1 %v3018_v36  ;;  %v899_v39 = vsub.f32 %v897_v63, %v898_v18  ;;  %1025 = vmatpush.msra.mxu0 %v898_v18 }
  0x5d   : > { %724 = vmatmul.f32.gmra.mxu0 %v3027_v43  ;;  %769 = vmatmul.f32.vlgmr.msrb.gmra.mxu1 %v2991_v2 }
  0x5e   : > { %1060 = vmatpush.msra.mxu1 %v3150_v46  ;;  %v900_v55 = vand.u32 4294901760, %v899_v39  ;;  %895 = vmatpush.msrb.mxu3 %v894_v49 }
  0x5f   : > { %1029 = vmatpush.msra.mxu0 %v904_v29  ;;  %852 = vmatpush.msrb.mxu2 %v851_v10 }
  0x60   : > { %1062 = vmatpush.msra.mxu1 %v3152_v48  ;;  %901 = vmatpush.msrb.mxu3 %v900_v55  ;;  %v1104_v55 = vld [vmem:[%s3470_s5] sm:$0xff] }
  0x61   : > { %941 = vmatpush.msra.mxu2 %v891_v59 }
  0x62   : > { %1064 = vmatpush.msra.mxu1 %v3154_v51 }
  0x63   : > { %944 = vmatpush.msra.mxu2 %v897_v63 }
  0x64   : > { %1066 = vmatpush.msra.mxu1 %v851_v10 }
  0x65   : > { %728 = vmatmul.f32.gmra.mxu0 %v3066_v45  ;;  %773 = vmatmul.f32.gmra.mxu1 %v3027_v43  ;;  %v905_v43 = vsub.f32 %v903_v0, %v904_v29 }
  0x66   : > { %947 = vmatpush.msra.mxu2 %v903_v0 }
  0x67   : > { %v906_v6 = vand.u32 4294901760, %v905_v43 }
  0x69   : > { %907 = vmatpush.msrb.mxu3 %v906_v6 }
  0x6d   : > { %732 = vmatmul.f32.gmra.mxu0 %v407_v32  ;;  %777 = vmatmul.f32.gmra.mxu1 %v3066_v45 }
  0x75   : > { %781 = vmatmul.f32.gmra.mxu1 %v407_v32 }
  0xb2   : > { %v389_v11 = vpop.f32.mrf.mxu0 }
  0xba   : > { %v397_v17 = vpop.f32.mrf.mxu0  ;;  %v514_v20 = vpop.f32.mrf.mxu1 }
  0xbb   : > { %v515_v27 = vadd.f32 %v514_v20, %v389_v11  ;;  %v909_v11 = vsub.f32 %v818_v9, %v851_v10 }
  0xbc   : > { %v580_v23 = vpop.f32.mrf.mxu2  ;;  %v634_v26 = vpop.f32.mrf.mxu3 }
  0xbd   : > { %v581_v34 = vadd.f32 %v580_v23, %v515_v27  ;;  %950 = vmatpush.msra.mxu2 %v909_v11 }
  0xbf   : > { %v635_v52 = vadd.f32 %v634_v26, %v581_v34 }
  0xc2   : > { %v405_v21 = vpop.f32.mrf.mxu0  ;;  %v518_v22 = vpop.f32.mrf.mxu1 }
  0xc3   : > { %v519_v54 = vadd.f32 %v518_v22, %v397_v17  ;;  %v910_v17 = vand.u32 4294901760, %v909_v11 }
  0xc4   : > { %v585_v35 = vpop.f32.mrf.mxu2  ;;  %v640_v58 = vpop.f32.mrf.mxu3 }
  0xc5   : > { %v586_v36 = vadd.f32 %v585_v35, %v519_v54  ;;  %v911_v20 = vsub.f32 %v909_v11, %v910_v17  ;;  %1033 = vmatpush.msra.mxu0 %v910_v17 }
  0xc7   : > { %v641_v56 = vadd.f32 %v640_v58, %v586_v36 }
  0xca   : > { %v413_v24 = vpop.f32.mrf.mxu0  ;;  %v522_v25 = vpop.f32.mrf.mxu1 }
  0xcb   : > { %v523_v60 = vadd.f32 %v522_v25, %v405_v21  ;;  %v912_v21 = vand.u32 4294901760, %v911_v20  ;;  %v1485_v20 = vld [vmem:[%s3472_s7 + $0x10] sm:$0xff] }
  0xcc   : > { %v590_v47 = vpop.f32.mrf.mxu2  ;;  %v646_v44 = vpop.f32.mrf.mxu3 }
  0xcd   : > { %v591_v50 = vadd.f32 %v590_v47, %v523_v60  ;;  %913 = vmatpush.msrb.mxu3 %v912_v21  ;;  %v1130_v60 = vand.u32 4294901760, %v1104_v55 }
  0xcf   : > { %v647_v61 = vadd.f32 %v646_v44, %v591_v50  ;;  %980 = vmatpush.msra.mxu3 %v3150_v46  ;;  %v1173_v6 = vsub.f32 %v1104_v55, %v1130_v60  ;;  %1241 = vmatpush.msrb.mxu1 %v1130_v60 }
  0xd1   : > { %982 = vmatpush.msra.mxu3 %v3152_v48  ;;  %1208 = vmatpush.msrb.mxu0 %v1173_v6 }
  0xd2   : > { %v526_v28 = vpop.f32.mrf.mxu1  ;;  %v721_v33 = vpop.f32.mrf.mxu0 }
  0xd3   : > { %v722_v1 = vadd.f32 %v721_v33, %v635_v52  ;;  %v527_v62 = vadd.f32 %v526_v28, %v413_v24  ;;  %984 = vmatpush.msra.mxu3 %v3154_v51 }
  0xd4   : > { %v595_v8 = vpop.f32.mrf.mxu2  ;;  %v652_v15 = vpop.f32.mrf.mxu3 }
  0xd5   : > { %v596_v32 = vadd.f32 %v595_v8, %v527_v62  ;;  %986 = vmatpush.msra.mxu3 %v851_v10 }
  0xd7   : > { %v653_v19 = vadd.f32 %v652_v15, %v596_v32 }
  0xda   : > { %v725_v2 = vpop.f32.mrf.mxu0  ;;  %v770_v12 = vpop.f32.mrf.mxu1 }
  0xdb   : > { %v771_v37 = vadd.f32 %v770_v12, %v722_v1  ;;  %v726_v31 = vadd.f32 %v725_v2, %v641_v56 }
  0xdd   : > { %785 = vxpose.xlu0.b32.start [1/4] (short) (narrow) %v771_v37, 24 }
  0xe2   : > { %v774_v45 = vpop.f32.mrf.mxu1  ;;  %v729_v57 = vpop.f32.mrf.mxu0 }
  0xe3   : > { %v775_v53 = vadd.f32 %v774_v45, %v726_v31  ;;  %v730_v30 = vadd.f32 %v729_v57, %v647_v61  ;;  %v817_v31 = vld [vmem:[%s3469_s4] sm:$0x7]  ;;  %v1174_v45 = vand.u32 4294901760, %v1173_v6 }
  0xe4   : > { %v3192_v10 = vperm.slane %v817_v31, 2 }
  0xe5   : > { %786 = vxpose.xlu0.b32.cont [2/4] (short) (narrow) %v775_v53, 24  ;;  %v1175_v50 = vsub.f32 %v1173_v6, %v1174_v45  ;;  %v822_v53 = vperm.slane %v817_v31, 0 }
  0xe7   : > { %v1176_v61 = vand.u32 4294901760, %v1175_v50 }
  0xea   : > { %v778_v7 = vpop.f32.mrf.mxu1  ;;  %v733_v16 = vpop.f32.mrf.mxu0 }
  0xeb   : > { %v779_v14 = vadd.f32 %v778_v7, %v730_v30  ;;  %v734_v3 = vadd.f32 %v733_v16, %v653_v19 }
  0xed   : > { %787 = vxpose.xlu0.b32.cont [3/4] (short) (narrow) %v779_v14, 24 }
  0xf2   : > { %v782_v4 = vpop.f32.mrf.mxu1 }
  0xf3   : > { %v783_v5 = vadd.f32 %v782_v4, %v734_v3  ;;  %v3185_v3 = vperm.slane %v817_v31, 1 }
  0xf5   : > { %788 = vxpose.xlu0.b32.end [4/4] (short) (narrow) %v783_v5, 24  ;;  %v1486_v5 = vld [vmem:[%s3472_s7 + $0x18] sm:$0xff] }
  0xf6   : > { %v3190_v9 = vand.u32 4294901760, %v1486_v5 }
 0x181   : > { %v801_v22 = vpop.trf.xlu0 }
 0x182   : > { %v825_v23 = vsel %vm823_vm0, %v801_v22, 0  ;;  %v1471_v24 = vsel %vm823_vm0, %v801_v22, 0.0 }
 0x183   : > { %v853_v25 = vand.u32 4294901760, %v825_v23 }
 0x185   : > { %v854_v26 = vsub.f32 %v825_v23, %v853_v25  ;;  %915 = vmatmul.f32.vlgmr.msrb.gmra.mxu3 %v853_v25  ;;  %1035 = vmatmul.f32.vlgmr.msra.gmra.mxu0 %v853_v25  ;;  %v3199_v23 = vsub.f32 %v1486_v5, %v3190_v9 }
 0x186   : > { %1068 = vmatmul.f32.vlgmr.msra.gmra.mxu1 %v853_v25  ;;  %1177 = vmatpush.msrb.mxu3 %v1176_v61 }
 0x187   : > { %v855_v27 = vand.u32 4294901760, %v854_v26  ;;  %1503 = vmatpush.msra.mxu0 %v3190_v9 }
 0x189   : > { %v802_v28 = vpop.trf.xlu0  ;;  %v856_v33 = vsub.f32 %v854_v26, %v855_v27 }
 0x18a   : > { %v828_v34 = vsel %vm823_vm0, %v802_v28, 0  ;;  %v1472_v35 = vsel %vm823_vm0, %v802_v28, 0.0 }
 0x18b   : > { %v861_v40 = vand.u32 4294901760, %v828_v34  ;;  %v1473_v41 = vadd.f32 %v1472_v35, %v1471_v24  ;;  %v857_v42 = vand.u32 4294901760, %v856_v33  ;;  %v3201_v24 = vand.u32 4294901760, %v1485_v20 }
 0x18c   : > { %v1533_v33 = vand.u32 4294901760, %v3199_v23 }
 0x18d   : > { %v862_v46 = vsub.f32 %v828_v34, %v861_v40  ;;  %v1476_v48 = vrot.slane %v1473_v41, 4  ;;  %858 = vmatmul.f32.vlgmr.msrb.gmra.mxu2 %v857_v42  ;;  %919 = vmatmul.f32.gmra.mxu3 %v861_v40  ;;  %v3212_v35 = vsub.f32 %v1485_v20, %v3201_v24 }
 0x18e   : > { %1039 = vmatmul.f32.gmra.mxu0 %v861_v40  ;;  %1072 = vmatmul.f32.gmra.mxu1 %v861_v40 }
 0x18f   : > { %v1477_v51 = vadd.f32 %v1476_v48, %v1473_v41  ;;  %v863_v52 = vand.u32 4294901760, %v862_v46  ;;  %1131 = vmatpush.msrb.mxu2 %v1130_v60  ;;  %1505 = vmatpush.msra.mxu0 %v3201_v24 }
 0x191   : > { %v1478_v54 = vrot.slane %v1477_v51, 2  ;;  %v803_v58 = vpop.trf.xlu0  ;;  %v864_v59 = vsub.f32 %v862_v46, %v863_v52 }
 0x192   : > { %v831_v63 = vsel %vm823_vm0, %v803_v58, 0 }
 0x193   : > { %v1479_v0 = vadd.f32 %v1478_v54, %v1477_v51  ;;  %v869_v1 = vand.u32 4294901760, %v831_v63  ;;  %v865_v2 = vand.u32 4294901760, %v864_v59  ;;  %v1534_v51 = vsub.f32 %v3199_v23, %v1533_v33 }
 0x195   : > { %v1480_v12 = vrot.slane %v1479_v0, 1  ;;  %v870_v13 = vsub.f32 %v831_v63, %v869_v1  ;;  %866 = vmatmul.f32.gmra.mxu2 %v865_v2  ;;  %923 = vmatmul.f32.gmra.mxu3 %v869_v1 }
 0x196   : > { %1043 = vmatmul.f32.gmra.mxu0 %v869_v1  ;;  %1076 = vmatmul.f32.gmra.mxu1 %v869_v1 }
 0x197   : > { %v1481_v18 = vadd.f32 %v1480_v12, %v1479_v0  ;;  %v871_v29 = vand.u32 4294901760, %v870_v13  ;;  %v1535_v0 = vand.u32 4294901760, %v1534_v51 }
 0x199   : > { %v1482_v36 = vmul.f32 0.0625, %v1481_v18  ;;  %v872_v37 = vsub.f32 %v870_v13, %v871_v29  ;;  %1536 = vmatpush.msra.mxu1 %v1535_v0 }
 0x19b   : > { %v3177_v38 = vsel %vm823_vm0, %v1482_v36, 0  ;;  %v873_v39 = vand.u32 4294901760, %v872_v37 }
 0x19d   : > { %874 = vmatmul.f32.gmra.mxu2 %v873_v39  ;;  %990 = vmatmul.f32.vlgmr.msra.gmra.mxu3 %v855_v27  ;;  %v1484_v27 = vld [vmem:[%s3472_s7 + $0x8] sm:$0xff] }
 0x19e   : > { %1309 = vmatpush.msra.mxu3 %v1130_v60  ;;  %v3209_v34 = vand.u32 4294901760, %v1484_v27 }
 0x1a0   : > { %1507 = vmatpush.msra.mxu0 %v3209_v34  ;;  %v3226_v58 = vsub.f32 %v1484_v27, %v3209_v34 }
 0x1a2   : > { %v1545_v2 = vand.u32 4294901760, %v3226_v58 }
 0x1a4   : > { %v1546_v39 = vsub.f32 %v3226_v58, %v1545_v2 }
 0x1a5   : > { %953 = vmatmul.f32.vlgmr.msra.gmra.mxu2 %v854_v26  ;;  %996 = vmatmul.f32.gmra.mxu3 %v863_v52  ;;  %v1539_v52 = vand.u32 4294901760, %v3212_v35 }
 0x1a6   : > { %1279 = vmatpush.msra.mxu2 %v1174_v45  ;;  %v1547_v60 = vand.u32 4294901760, %v1546_v39 }
 0x1a7   : > { %v1540_v1 = vsub.f32 %v3212_v35, %v1539_v52 }
 0x1a9   : > { %v1541_v37 = vand.u32 4294901760, %v1540_v1 }
 0x1ab   : > { %1542 = vmatpush.msra.mxu1 %v1541_v37 }
 0x1ad   : > { %958 = vmatmul.f32.gmra.mxu2 %v862_v46  ;;  %1002 = vmatmul.f32.gmra.mxu3 %v871_v29  ;;  %v1483_v46 = vld [vmem:[%s3472_s7] sm:$0xff] }
 0x1ae   : > { %v3223_v54 = vand.u32 4294901760, %v1483_v46  ;;  %1548 = vmatpush.msra.mxu1 %v1547_v60 }
 0x1b0   : > { %1509 = vmatpush.msra.mxu0 %v3223_v54  ;;  %v3234_v12 = vsub.f32 %v1483_v46, %v3223_v54 }
 0x1b5   : > { %963 = vmatmul.f32.gmra.mxu2 %v870_v13 }
 0x202   : > { %v1036_v7 = vpop.f32.mrf.mxu0 }
 0x203   : > { %v1069_v15 = vpop.f32.mrf.mxu1 }
 0x208   : > { %v916_v43 = vpop.f32.mrf.mxu3 }
 0x20b   : > { %v1040_v28 = vpop.f32.mrf.mxu0  ;;  %v1073_v48 = vpop.f32.mrf.mxu1 }
 0x210   : > { %v859_v47 = vpop.f32.mrf.mxu2  ;;  %v920_v49 = vpop.f32.mrf.mxu3 }
 0x211   : > { %v860_v62 = vadd.f32 %v859_v47, %v822_v53 }
 0x213   : > { %v917_v30 = vadd.f32 %v916_v43, %v860_v62  ;;  %v1551_v43 = vand.u32 4294901760, %v3234_v12  ;;  %v1044_v50 = vpop.f32.mrf.mxu0 }
 0x215   : > { %v1552_v6 = vsub.f32 %v3234_v12, %v1551_v43 }
 0x218   : > { %v867_v56 = vpop.f32.mrf.mxu2  ;;  %v924_v44 = vpop.f32.mrf.mxu3 }
 0x219   : > { %v868_v16 = vadd.f32 %v867_v56, %v822_v53 }
 0x21b   : > { %v921_v17 = vadd.f32 %v920_v49, %v868_v16 }
 0x220   : > { %v875_v57 = vpop.f32.mrf.mxu2  ;;  %v991_v8 = vpop.f32.mrf.mxu3 }
 0x221   : > { %v876_v40 = vadd.f32 %v875_v57, %v822_v53  ;;  %v1553_v53 = vand.u32 4294901760, %v1552_v6 }
 0x223   : > { %v925_v29 = vadd.f32 %v924_v44, %v876_v40  ;;  %1554 = vmatpush.msra.mxu1 %v1553_v53 }
 0x228   : > { %v954_v32 = vpop.f32.mrf.mxu2  ;;  %v997_v21 = vpop.f32.mrf.mxu3 }
 0x229   : > { %v955_v14 = vadd.f32 %v954_v32, %v917_v30 }
 0x22b   : > { %v992_v19 = vadd.f32 %v991_v8, %v955_v14  ;;  %v1077_v8 = vpop.f32.mrf.mxu1 }
 0x22d   : > { %v1037_v4 = vadd.f32 %v1036_v7, %v992_v19 }
 0x22f   : > { %v1070_v11 = vadd.f32 %v1069_v15, %v1037_v4 }
 0x230   : > { %v959_v22 = vpop.f32.mrf.mxu2  ;;  %v1003_v56 = vpop.f32.mrf.mxu3 }
 0x231   : > { %v1081_v25 = vmul.f32 %v3185_v3, %v1070_v11  ;;  %v960_v26 = vadd.f32 %v959_v22, %v921_v17 }
 0x233   : > { %v1085_v41 = vadd.f32 %v3192_v10, %v1081_v25  ;;  %v998_v42 = vadd.f32 %v997_v21, %v960_v26 }
 0x235   : > { %v1088_v59 = vadd.f32 3.0, %v1085_v41  ;;  %v1041_v63 = vadd.f32 %v1040_v28, %v998_v42 }
 0x237   : > { %v1091_v13 = vmax.f32 %v1088_v59, 0.0  ;;  %v1074_v18 = vadd.f32 %v1073_v48, %v1041_v63 }
 0x238   : > { %v964_v36 = vpop.f32.mrf.mxu2 }
 0x239   : > { %v1082_v47 = vmul.f32 %v3185_v3, %v1074_v18  ;;  %v965_v49 = vadd.f32 %v964_v36, %v925_v29  ;;  %v1094_v55 = vmin.f32 %v1091_v13, 6.0  ;;  %v3267_v13 = vld [vmem:[%s3471_s6] sm:$0xf] }
 0x23a   : > { %v1343_v18 = vperm.slane %v3267_v13, 1 }
 0x23b   : > { %v1086_v31 = vadd.f32 %v3192_v10, %v1082_v47  ;;  %v1004_v44 = vadd.f32 %v1003_v56, %v965_v49  ;;  %v1097_v45 = vmul.f32 %v1094_v55, %v1085_v41 }
 0x23c   : > { %1345 = vrot.lane.b32.xlu1 %v1343_v18, %s2712_s22  ;;  %s2569_s22 = sshll.u32 %s323_s21, 5 }
 0x23d   : > { %v1089_v57 = vadd.f32 3.0, %v1086_v31  ;;  %v1045_v61 = vadd.f32 %v1044_v50, %v1004_v44  ;;  %v1100_v62 = vmul.f32 0.16666667, %v1097_v45  ;;  %s3421_s23 = scalar_lea.vmem [#allocation2], %s2569_s22 }
 0x23e   : > { %s2500_s29 = sshll.u32 %s3421_s23, 4  ;;  %s2501_s29 = int_to_ptr.vmem [resolvable:$true] %s2500_s29 }
 0x23f   : > { %v1092_v30 = vmax.f32 %v1089_v57, 0.0  ;;  %v1078_v7 = vadd.f32 %v1077_v8, %v1045_v61  ;;  %v1107_v32 = vsel %vm1105_vm1, %v1100_v62, 0 }
 0x240   : > { %v3246_v14 = vand.u32 4294901760, %v1107_v32 }
 0x241   : > { %v1083_v15 = vmul.f32 %v3185_v3, %v1078_v7  ;;  %v1095_v16 = vmin.f32 %v1092_v30, 6.0 }
 0x242   : > { %1179 = vmatmul.f32.vlgmr.msrb.gmra.mxu3 %v3246_v14  ;;  %v1133_v19 = vsub.f32 %v1107_v32, %v3246_v14 }
 0x243   : > { %v1087_v4 = vadd.f32 %v3192_v10, %v1083_v15  ;;  %v1098_v5 = vmul.f32 %v1095_v16, %v1086_v31  ;;  %v1510_v10 = vand.u32 4294901760, %v3177_v38 }
 0x244   : > { %1211 = vmatmul.f32.vlgmr.msrb.gmra.mxu0 %v1133_v19  ;;  %v1134_v11 = vand.u32 4294901760, %v1133_v19 }
 0x245   : > { %v1090_v17 = vadd.f32 3.0, %v1087_v4  ;;  %v1101_v20 = vmul.f32 0.16666667, %v1098_v5  ;;  %1574 = vmatpush.msrb.mxu0 %v3199_v23  ;;  %v1511_v46 = vsub.f32 %v3177_v38, %v1510_v10 }
 0x246   : > { %1245 = vmatmul.f32.vlgmr.msrb.gmra.mxu1 %v1134_v11  ;;  %v1135_v21 = vsub.f32 %v1133_v19, %v1134_v11 }
 0x247   : > { %v1093_v22 = vmax.f32 %v1090_v17, 0.0  ;;  %v1110_v25 = vsel %vm1105_vm1, %v1101_v20, 0  ;;  %1577 = vmatpush.msrb.mxu0 %v3212_v35  ;;  %1603 = vmatpush.msrb.mxu1 %v3190_v9  ;;  %v1512_v1 = vand.u32 4294901760, %v1511_v46 }
 0x248   : > { %v1136_v3 = vand.u32 4294901760, %v1135_v21  ;;  %v1140_v26 = vand.u32 4294901760, %v1110_v25 }
 0x249   : > { %v1096_v27 = vmin.f32 %v1093_v22, 6.0  ;;  %1580 = vmatpush.msrb.mxu0 %v3226_v58  ;;  %1605 = vmatpush.msrb.mxu1 %v3201_v24  ;;  %v1513_v36 = vsub.f32 %v1511_v46, %v1512_v1 }
 0x24a   : > { %1137 = vmatmul.f32.vlgmr.msrb.gmra.mxu2 %v1136_v3  ;;  %1183 = vmatmul.f32.gmra.mxu3 %v1140_v26  ;;  %v1141_v28 = vsub.f32 %v1110_v25, %v1140_v26 }
 0x24b   : > { %v1099_v40 = vmul.f32 %v1096_v27, %v1087_v4  ;;  %1583 = vmatpush.msrb.mxu0 %v3234_v12  ;;  %1607 = vmatpush.msrb.mxu1 %v3209_v34  ;;  %v1514_v39 = vand.u32 4294901760, %v1513_v36 }
 0x24c   : > { %1216 = vmatmul.f32.gmra.mxu0 %v1141_v28  ;;  %v1142_v41 = vand.u32 4294901760, %v1141_v28 }
 0x24d   : > { %v1102_v42 = vmul.f32 0.16666667, %v1099_v40  ;;  %1609 = vmatpush.msrb.mxu1 %v3223_v54 }
 0x24e   : > { %1251 = vmatmul.f32.gmra.mxu1 %v1142_v41  ;;  %v1143_v48 = vsub.f32 %v1141_v28, %v1142_v41 }
 0x24f   : > { %v1113_v51 = vsel %vm1105_vm1, %v1102_v42, 0 }
 0x250   : > { %v1144_v59 = vand.u32 4294901760, %v1143_v48  ;;  %v1148_v63 = vand.u32 4294901760, %v1113_v51 }
 0x252   : > { %1145 = vmatmul.f32.gmra.mxu2 %v1144_v59  ;;  %1187 = vmatmul.f32.gmra.mxu3 %v1148_v63  ;;  %v1149_v0 = vsub.f32 %v1113_v51, %v1148_v63 }
 0x254   : > { %1221 = vmatmul.f32.gmra.mxu0 %v1149_v0  ;;  %v1150_v29 = vand.u32 4294901760, %v1149_v0 }
 0x256   : > { %1257 = vmatmul.f32.gmra.mxu1 %v1150_v29  ;;  %v1151_v38 = vsub.f32 %v1149_v0, %v1150_v29 }
 0x258   : > { %v1152_v37 = vand.u32 4294901760, %v1151_v38 }
 0x25a   : > { %1153 = vmatmul.f32.gmra.mxu2 %v1152_v37  ;;  %1311 = vmatmul.f32.vlgmr.msra.gmra.mxu3 %v3246_v14 }
 0x25c   : > { %1515 = vmatmul.f32.vlgmr.msra.gmra.mxu0 %v1514_v39 }
 0x25d   : > { %1632 = vmatpush.msra.mxu0 %v1533_v33  ;;  %v1676_v33 = vld [vmem:[%s3473_s8] sm:$0x3] }
 0x25e   : > { %1556 = vmatmul.f32.vlgmr.msra.gmra.mxu1 %v1510_v10  ;;  %v1683_v35 = vsel %vm1681_vm2, %v1676_v33, 0 }
 0x25f   : > { %1636 = vmatpush.msra.mxu0 %v1539_v52  ;;  %1663 = vmatpush.msra.mxu1 %v3190_v9 }
 0x261   : > { %1640 = vmatpush.msra.mxu0 %v1545_v2  ;;  %1665 = vmatpush.msra.mxu1 %v3201_v24 }
 0x262   : > { %1281 = vmatmul.f32.vlgmr.msra.gmra.mxu2 %v3246_v14  ;;  %1315 = vmatmul.f32.gmra.mxu3 %v1140_v26 }
 0x263   : > { %1644 = vmatpush.msra.mxu0 %v1551_v43  ;;  %1667 = vmatpush.msra.mxu1 %v3209_v34  ;;  %v1700_v34 = vand.u32 4294901760, %v1683_v35 }
 0x264   : > { %1586 = vmatmul.f32.vlgmr.msrb.gmra.mxu0 %v1511_v46 }
 0x265   : > { %1669 = vmatpush.msra.mxu1 %v3223_v54  ;;  %v1727_v2 = vsub.f32 %v1683_v35, %v1700_v34  ;;  %1701 = vmatpush.msrb.mxu2 %v1700_v34 }
 0x266   : > { %1613 = vmatmul.f32.vlgmr.msrb.gmra.mxu1 %v1512_v1 }
 0x267   : > { %1777 = vmatpush.msrb.mxu1 %v1700_v34  ;;  %v1728_v12 = vand.u32 4294901760, %v1727_v2  ;;  %1754 = vmatpush.msrb.mxu0 %v1727_v2 }
 0x269   : > { %v1729_v47 = vsub.f32 %v1727_v2, %v1728_v12  ;;  %1803 = vmatpush.msra.mxu2 %v1728_v12 }
 0x26a   : > { %1285 = vmatmul.f32.gmra.mxu2 %v1140_v26  ;;  %1319 = vmatmul.f32.gmra.mxu3 %v1148_v63 }
 0x26b   : > { %v1730_v55 = vand.u32 4294901760, %v1729_v47 }
 0x26c   : > { %1646 = vmatmul.f32.vlgmr.msra.gmra.mxu0 %v1510_v10 }
 0x26d   : > { %1731 = vmatpush.msrb.mxu3 %v1730_v55 }
 0x26e   : > { %1671 = vmatmul.f32.vlgmr.msra.gmra.mxu1 %v1510_v10 }
 0x26f   : > { %1825 = vmatpush.msra.mxu3 %v1700_v34 }
 0x272   : > { %1289 = vmatmul.f32.gmra.mxu2 %v1148_v63 }
 0x2ae   : > { %v1346_v16 = vpop.permute.xlu1 %1345 }
 0x2c1   : > { %v1212_v9 = vpop.f32.mrf.mxu0 }
 0x2c3   : > { %v1246_v23 = vpop.f32.mrf.mxu1 }
 0x2c5   : > { %v1180_v24 = vpop.f32.mrf.mxu3 }
 0x2c9   : > { %v1217_v52 = vpop.f32.mrf.mxu0 }
 0x2cb   : > { %v1252_v58 = vpop.f32.mrf.mxu1 }
 0x2cd   : > { %v1138_v54 = vpop.f32.mrf.mxu2  ;;  %v1184_v43 = vpop.f32.mrf.mxu3 }
 0x2ce   : > { %v1181_v45 = vadd.f32 %v1180_v24, %v1138_v54 }
 0x2d0   : > { %v1213_v53 = vadd.f32 %v1212_v9, %v1181_v45 }
 0x2d1   : > { %v1222_v49 = vpop.f32.mrf.mxu0 }
 0x2d2   : > { %v1247_v32 = vadd.f32 %v1246_v23, %v1213_v53 }
 0x2d3   : > { %v1258_v56 = vpop.f32.mrf.mxu1 }
 0x2d5   : > { %v1146_v60 = vpop.f32.mrf.mxu2  ;;  %v1188_v6 = vpop.f32.mrf.mxu3 }
 0x2d6   : > { %v1185_v30 = vadd.f32 %v1184_v43, %v1146_v60  ;;  %v1323_v43 = vperm.slane %v3267_v13, 0 }
 0x2d8   : > { %v1218_v19 = vadd.f32 %v1217_v52, %v1185_v30 }
 0x2d9   : > { %v1516_v31 = vpop.f32.mrf.mxu0 }
 0x2da   : > { %v1253_v26 = vadd.f32 %v1252_v58, %v1218_v19 }
 0x2db   : > { %v1557_v44 = vpop.f32.mrf.mxu1 }
 0x2dc   : > { %v1558_v61 = vadd.f32 %v1557_v44, %v1516_v31 }
 0x2dd   : > { %v1154_v50 = vpop.f32.mrf.mxu2  ;;  %v1312_v62 = vpop.f32.mrf.mxu3 }
 0x2de   : > { %v1189_v22 = vadd.f32 %v1188_v6, %v1154_v50  ;;  %v1339_v50 = vperm.slane %v3267_v13, 2 }
 0x2e0   : > { %v1223_v41 = vadd.f32 %v1222_v49, %v1189_v22 }
 0x2e1   : > { %v1587_v57 = vpop.f32.mrf.mxu0 }
 0x2e2   : > { %v1588_v7 = vadd.f32 %v1587_v57, %v1558_v61  ;;  %v1259_v63 = vadd.f32 %v1258_v56, %v1223_v41 }
 0x2e3   : > { %v1614_v8 = vpop.f32.mrf.mxu1 }
 0x2e4   : > { %v1615_v4 = vadd.f32 %v1614_v8, %v1588_v7 }
 0x2e5   : > { %v1282_v14 = vpop.f32.mrf.mxu2  ;;  %v1316_v27 = vpop.f32.mrf.mxu3 }
 0x2e6   : > { %v1283_v15 = vadd.f32 %v1282_v14, %v1247_v32 }
 0x2e8   : > { %v1313_v5 = vadd.f32 %v1312_v62, %v1283_v15  ;;  %v1363_v15 = vlaneseq }
 0x2e9   : > { %v1647_v11 = vpop.f32.mrf.mxu0 }
 0x2ea   : > { %v1348_v17 = vadd.f32 %v1346_v16, %v1313_v5  ;;  %v1648_v20 = vadd.f32 %v1647_v11, %v1615_v4  ;;  %v1324_v47 = vadd.f32 %v1323_v43, %v1313_v5  ;;  %v3294_v5 = vperm.slane %v3267_v13, 3 }
 0x2eb   : > { %v1672_v21 = vpop.f32.mrf.mxu1 }
 0x2ec   : > { %v1351_v25 = vmul.f32 0.5, %v1348_v17  ;;  %v1673_v3 = vadd.f32 %v1672_v21, %v1648_v20  ;;  %v1327_v49 = vmul.f32 0.5, %v1324_v47  ;;  %v3353_v47 = vand.u32 127, %v1363_v15 }
 0x2ed   : > { %v1286_v10 = vpop.f32.mrf.mxu2  ;;  %v1320_v37 = vpop.f32.mrf.mxu3 }
 0x2ee   : > { %v1675_v28 = vmax.f32 %v1673_v3, 0.0  ;;  %v1287_v40 = vadd.f32 %v1286_v10, %v1253_v26  ;;  %2630 = vtanh.f32 %v1351_v25  ;;  %vm1365_vm4 = vcmp.lt.s32.totalorder %v3353_v47, 16 }
 0x2ef   : > { %vm1404_vm6 = vcmp.ge.s32.totalorder %v3353_v47, 16 }
 0x2f0   : > { %v1679_v42 = vsel %vm1677_vm3, %v1675_v28, 0  ;;  %v1317_v46 = vadd.f32 %v1316_v27, %v1287_v40 }
 0x2f1   : > { %v1702_v48 = vand.u32 4294901760, %v1679_v42 }
 0x2f2   : > { %v1349_v51 = vadd.f32 %v1346_v16, %v1317_v46  ;;  %v1325_v55 = vadd.f32 %v1323_v43, %v1317_v46 }
 0x2f3   : > { %v1703_v59 = vsub.f32 %v1679_v42, %v1702_v48  ;;  %1733 = vmatmul.f32.vlgmr.msrb.gmra.mxu3 %v1702_v48  ;;  %v1841_v42 = vld [vmem:[%s3467_s2 + $0x10] sm:$0xff] }
 0x2f4   : > { %v1352_v0 = vmul.f32 0.5, %v1349_v51  ;;  %v2631_v1 = vpop.eup %2630  ;;  %v1328_v56 = vmul.f32 0.5, %v1325_v55  ;;  %v3300_v46 = vand.u32 4294901760, %v1841_v42 }
 0x2f5   : > { %v1290_v18 = vpop.f32.mrf.mxu2  ;;  %1757 = vmatmul.f32.vlgmr.msrb.gmra.mxu0 %v1703_v59  ;;  %v1704_v29 = vand.u32 4294901760, %v1703_v59  ;;  %v1357_v36 = vadd.f32 1.0, %v2631_v1 }
 0x2f6   : > { %v1291_v38 = vadd.f32 %v1290_v18, %v1259_v63  ;;  %2632 = vtanh.f32 %v1352_v0  ;;  %v3304_v51 = vsub.f32 %v1841_v42, %v3300_v46  ;;  %1869 = vmatpush.msra.mxu0 %v3300_v46  ;;  %2012 = vmatpush.msrb.mxu3 %v3300_v46  ;;  %v1836_v18 = vrot.slane %v3267_v13, 2  ;;  %v1840_v13 = vld [vmem:[%s3467_s2 + $0x8] sm:$0xff] }
 0x2f7   : > { %1781 = vmatmul.f32.vlgmr.msrb.gmra.mxu1 %v1704_v29  ;;  %v1705_v39 = vsub.f32 %v1703_v59, %v1704_v29  ;;  %v1360_v23 = vmul.f32 0.5, %v1357_v36 }
 0x2f8   : > { %v1321_v9 = vadd.f32 %v1320_v37, %v1291_v38  ;;  %v3309_v59 = vand.u32 4294901760, %v3304_v51 }
 0x2f9   : > { %v1706_v24 = vand.u32 4294901760, %v1705_v39  ;;  %1408 = vrot.lane.b32.xlu1 %v1360_v23, %s2713_s26  ;;  %v1839_v23 = vld [vmem:[%s3467_s2] sm:$0xff] }
 0x2fa   : > { %v1350_v33 = vadd.f32 %v1346_v16, %v1321_v9  ;;  %v1326_v6 = vadd.f32 %v1323_v43, %v1321_v9  ;;  %v3290_v16 = vshrl.u32 %v1363_v15, 7  ;;  %v1923_v0 = vsub.f32 %v3304_v51, %v3309_v59 }
 0x2fb   : > { %1707 = vmatmul.f32.vlgmr.msrb.gmra.mxu2 %v1706_v24  ;;  %1827 = vmatmul.f32.vlgmr.msra.gmra.mxu3 %v1702_v48  ;;  %v1870_v9 = vand.u32 4294901760, %v1840_v13 }
 0x2fc   : > { %v1353_v35 = vmul.f32 0.5, %v1350_v33  ;;  %v2633_v52 = vpop.eup %2632  ;;  %v1329_v44 = vmul.f32 0.5, %v1326_v6  ;;  %2623 = vset.pattern.permute.xlu0 %v3290_v16  ;;  %1970 = vmatpush.msrb.mxu2 %v3304_v51  ;;  %v1924_v29 = vand.u32 4294901760, %v1923_v0  ;;  %v3319_v39 = vadd.s32 24, %v3290_v16 }
 0x2fd   : > { %v1358_v34 = vadd.f32 1.0, %v2633_v52  ;;  %v3331_v24 = vsub.f32 %v1840_v13, %v1870_v9  ;;  %v3333_v33 = vand.u32 4294901760, %v1839_v23  ;;  %1871 = vmatpush.msra.mxu0 %v1870_v9  ;;  %2014 = vmatpush.msrb.mxu3 %v1870_v9  ;;  %v2410_v43 = vadd.s32 8, %v3290_v16 }
 0x2fe   : > { %2634 = vtanh.f32 %v1353_v35  ;;  %1925 = vmatpush.msra.mxu1 %v1924_v29 }
 0x2ff   : > { %v1361_v58 = vmul.f32 0.5, %v1358_v34  ;;  %2636 = vtanh.f32 %v1327_v49  ;;  %v1928_v35 = vand.u32 4294901760, %v3331_v24  ;;  %v3337_v52 = vsub.f32 %v1839_v23, %v3333_v33  ;;  %1873 = vmatpush.msra.mxu0 %v3333_v33  ;;  %1973 = vmatpush.msrb.mxu2 %v3331_v24 }
 0x300   : > { %2638 = vtanh.f32 %v1328_v56  ;;  %2016 = vmatpush.msrb.mxu3 %v3333_v33 }
 0x301   : > { %1410 = vrot.lane.b32.xlu2 %v1361_v58, %s2713_s26  ;;  %2640 = vtanh.f32 %v1329_v44  ;;  %2058 = vmatpush.msrb.mxu0 %v3309_v59  ;;  %v1929_v34 = vsub.f32 %v3331_v24, %v1928_v35  ;;  %v1934_v58 = vand.u32 4294901760, %v3337_v52 }
 0x302   : > { %1976 = vmatpush.msrb.mxu2 %v3337_v52  ;;  %2202 = vmatpush.msra.mxu3 %v1924_v29 }
 0x303   : > { %1805 = vmatmul.f32.vlgmr.msra.gmra.mxu2 %v1702_v48  ;;  %v2416_v48 = vadd.s32 16, %v3290_v16  ;;  %2062 = vmatpush.msrb.mxu0 %v1928_v35 }
 0x304   : > { %v2635_v2 = vpop.eup %2634  ;;  %2439 = vperm.xlu0 %2623, %v3294_v5   ;;  %2146 = vmatpush.msra.mxu2 %v3300_v46 }
 0x305   : > { %v1359_v54 = vadd.f32 1.0, %v2635_v2  ;;  %v2637_v60 = vpop.eup %2636  ;;  %v1930_v2 = vand.u32 4294901760, %v1929_v34  ;;  %2066 = vmatpush.msrb.mxu0 %v1934_v58 }
 0x306   : > { %v1333_v31 = vadd.f32 1.0, %v2637_v60  ;;  %v2639_v53 = vpop.eup %2638  ;;  %2148 = vmatpush.msra.mxu2 %v1870_v9 }
 0x307   : > { %v1362_v12 = vmul.f32 0.5, %v1359_v54  ;;  %v1334_v61 = vadd.f32 1.0, %v2639_v53  ;;  %v2641_v8 = vpop.eup %2640  ;;  %v1935_v54 = vsub.f32 %v3337_v52, %v1934_v58  ;;  %1931 = vmatpush.msra.mxu1 %v1930_v2  ;;  %2208 = vmatpush.msra.mxu3 %v1930_v2 }
 0x308   : > { %v1336_v45 = vmul.f32 0.5, %v1333_v31  ;;  %v1335_v7 = vadd.f32 1.0, %v2641_v8  ;;  %2150 = vmatpush.msra.mxu2 %v3333_v33 }
 0x309   : > { %1412 = vrot.lane.b32.xlu2 %v1362_v12, %s2713_s26  ;;  %v1337_v62 = vmul.f32 0.5, %v1334_v61  ;;  %v1936_v12 = vand.u32 4294901760, %v1935_v54 }
 0x30a   : > { %v1340_v57 = vmul.f32 %v1339_v50, %v1336_v45  ;;  %v1338_v32 = vmul.f32 0.5, %v1335_v7 }
 0x30b   : > { %v1341_v30 = vmul.f32 %v1339_v50, %v1337_v62  ;;  %1937 = vmatpush.msra.mxu1 %v1936_v12  ;;  %2214 = vmatpush.msra.mxu3 %v1936_v12 }
 0x30c   : > { %v1342_v14 = vmul.f32 %v1339_v50, %v1338_v32 }
 0x30d   : > { %2098 = vmatpush.msrb.mxu1 %v3300_v46 }
 0x30f   : > { %2100 = vmatpush.msrb.mxu1 %v1870_v9 }
 0x311   : > { %2102 = vmatpush.msrb.mxu1 %v3333_v33 }
 0x32e   : > { %1366 = vxpose.xlu1.b32.start [1/3] (short) (narrow) %v1340_v57, 32 }
 0x336   : > { %1367 = vxpose.xlu1.b32.cont [2/3] (short) (narrow) %v1341_v30, 32 }
 0x33e   : > { %1368 = vxpose.xlu1.b32.end [3/3] (short) (narrow) %v1342_v14, 32 }
 0x35b   : > { %v1411_v4 = vpop.permute.xlu2 %1410 }
 0x363   : > { %v1413_v11 = vpop.permute.xlu2 %1412 }
 0x36b   : > { %v1409_v19 = vpop.permute.xlu1 %1408 }
 0x36c   : > { %1417 = vxpose.xlu2.b32.start [1/3] (short) (narrow) %v1409_v19, 32 }
 0x372   : > { %v1758_v22 = vpop.f32.mrf.mxu0 }
 0x374   : > { %1418 = vxpose.xlu2.b32.cont [2/3] (short) (narrow) %v1411_v4, 32  ;;  %v1782_v3 = vpop.f32.mrf.mxu1 }
 0x376   : > { %v1734_v17 = vpop.f32.mrf.mxu3 }
 0x37c   : > { %1419 = vxpose.xlu2.b32.end [3/3] (short) (narrow) %v1413_v11, 32 }
 0x37e   : > { %v1708_v20 = vpop.f32.mrf.mxu2  ;;  %v1828_v28 = vpop.f32.mrf.mxu3 }
 0x37f   : > { %v1735_v21 = vadd.f32 %v1734_v17, %v1708_v20 }
 0x381   : > { %v1759_v25 = vadd.f32 %v1758_v22, %v1735_v21 }
 0x383   : > { %v1783_v26 = vadd.f32 %v1782_v3, %v1759_v25 }
 0x386   : > { %v1806_v27 = vpop.f32.mrf.mxu2 }
 0x387   : > { %v1807_v10 = vadd.f32 %v1806_v27, %v1783_v26 }
 0x389   : > { %v1829_v40 = vadd.f32 %v1828_v28, %v1807_v10 }
 0x38b   : > { %v1831_v41 = vmul.f32 0.5, %v1829_v40 }
 0x38d   : > { %2642 = vtanh.f32 %v1831_v41 }
 0x391   : > { %2625 = vset.pattern.permute.xlu1 %v2416_v48 }
 0x393   : > { %v2643_v63 = vpop.eup %2642 }
 0x394   : > { %v1833_v1 = vadd.f32 1.0, %v2643_v63 }
 0x396   : > { %v1834_v38 = vmul.f32 0.5, %v1833_v1 }
 0x398   : > { %v1838_v36 = vmul.f32 %v1836_v18, %v1834_v38 }
 0x39a   : > { %v3315_v37 = vperm.slane %v1838_v36, 0 }
 0x39c   : > { %2406 = vperm.xlu0 %2623, %v3315_v37  }
 0x3a0   : > { %2418 = vperm.xlu1 %2625, %v3315_v37  }
 0x3a4   : > { %2626 = vset.pattern.permute.xlu0 %v3319_v39 }
 0x3a8   : > { %2451 = vperm.xlu1 %2625, %v3294_v5  }
 0x3ac   : > { %2424 = vperm.xlu0 %2626, %v3315_v37  }
 0x3b4   : > { %2627 = vset.pattern.permute.xlu0 %v2410_v43 }
 0x3bc   : > { %2445 = vperm.xlu0 %2627, %v3294_v5  }
 0x3c4   : > { %2629 = vset.pattern.permute.xlu0 %v3319_v39 }
 0x3d2   : > { %v1382_v49 = vpop.trf.xlu1 }
 0x3d3   : > { %v1400_v55 = vsel %vm1365_vm4, %v1382_v49, 0.0 }
 0x3d4   : > { %v1844_v56 = vsel %vm1842_vm5, %v1400_v55, 0 }
 0x3d5   : > { %v1874_v60 = vand.u32 4294901760, %v1844_v56 }
 0x3d7   : > { %v1875_v6 = vsub.f32 %v1844_v56, %v1874_v60  ;;  %1939 = vmatmul.f32.vlgmr.msra.gmra.mxu1 %v1874_v60 }
 0x3d8   : > { %2289 = vmatpush.msra.mxu1 %v3300_v46 }
 0x3d9   : > { %v1876_v31 = vand.u32 4294901760, %v1875_v6  ;;  %1979 = vmatmul.f32.vlgmr.msrb.gmra.mxu2 %v1875_v6 }
 0x3da   : > { %v1383_v44 = vpop.trf.xlu1  ;;  %2335 = vmatpush.msrb.mxu2 %v3309_v59  ;;  %2291 = vmatpush.msra.mxu1 %v1870_v9 }
 0x3db   : > { %v1877_v45 = vsub.f32 %v1875_v6, %v1876_v31  ;;  %v1401_v50 = vsel %vm1365_vm4, %v1383_v44, 0.0  ;;  %2020 = vmatmul.f32.vlgmr.msrb.gmra.mxu3 %v1876_v31 }
 0x3dc   : > { %v1847_v53 = vsel %vm1842_vm5, %v1401_v50, 0  ;;  %2375 = vmatpush.msrb.mxu3 %v3300_v46  ;;  %2293 = vmatpush.msra.mxu1 %v3333_v33 }
 0x3dd   : > { %v1882_v57 = vand.u32 4294901760, %v1847_v53  ;;  %v1878_v61 = vand.u32 4294901760, %v1877_v45  ;;  %2339 = vmatpush.msrb.mxu2 %v1928_v35 }
 0x3de   : > { %2624 = vset.pattern.permute.xlu2 %v2410_v43  ;;  %2377 = vmatpush.msrb.mxu3 %v1870_v9 }
 0x3df   : > { %v1883_v62 = vsub.f32 %v1847_v53, %v1882_v57  ;;  %1879 = vmatmul.f32.vlgmr.msra.gmra.mxu0 %v1878_v61  ;;  %1943 = vmatmul.f32.gmra.mxu1 %v1882_v57 }
 0x3e0   : > { %2247 = vmatpush.msra.mxu0 %v3304_v51  ;;  %2343 = vmatpush.msrb.mxu2 %v1934_v58 }
 0x3e1   : > { %v1884_v8 = vand.u32 4294901760, %v1883_v62  ;;  %1984 = vmatmul.f32.gmra.mxu2 %v1883_v62  ;;  %2379 = vmatpush.msrb.mxu3 %v3333_v33 }
 0x3e2   : > { %v1384_v30 = vpop.trf.xlu1  ;;  %2250 = vmatpush.msra.mxu0 %v3331_v24 }
 0x3e3   : > { %v1402_v7 = vsel %vm1365_vm4, %v1384_v30, 0.0  ;;  %v1885_v32 = vsub.f32 %v1883_v62, %v1884_v8  ;;  %2026 = vmatmul.f32.gmra.mxu3 %v1884_v8 }
 0x3e4   : > { %v1850_v14 = vsel %vm1842_vm5, %v1402_v7, 0  ;;  %2253 = vmatpush.msra.mxu0 %v3337_v52 }
 0x3e5   : > { %v1890_v15 = vand.u32 4294901760, %v1850_v14  ;;  %v1886_v16 = vand.u32 4294901760, %v1885_v32 }
 0x3e7   : > { %v1891_v19 = vsub.f32 %v1850_v14, %v1890_v15  ;;  %1887 = vmatmul.f32.gmra.mxu0 %v1886_v16  ;;  %1947 = vmatmul.f32.gmra.mxu1 %v1890_v15 }
 0x3e9   : > { %v1892_v4 = vand.u32 4294901760, %v1891_v19  ;;  %1989 = vmatmul.f32.gmra.mxu2 %v1891_v19 }
 0x3ea   : > { %v1385_v11 = vpop.trf.xlu1 }
 0x3eb   : > { %v1403_v17 = vsel %vm1365_vm4, %v1385_v11, 0.0  ;;  %v1893_v20 = vsub.f32 %v1891_v19, %v1892_v4  ;;  %2032 = vmatmul.f32.gmra.mxu3 %v1892_v4 }
 0x3ec   : > { %v1853_v21 = vsel %vm1842_vm5, %v1403_v17, 0 }
 0x3ed   : > { %v1898_v22 = vand.u32 4294901760, %v1853_v21  ;;  %2412 = vperm.xlu2 %2624, %v3315_v37   ;;  %v1894_v25 = vand.u32 4294901760, %v1893_v20 }
 0x3ef   : > { %v1899_v3 = vsub.f32 %v1853_v21, %v1898_v22  ;;  %1895 = vmatmul.f32.gmra.mxu0 %v1894_v25  ;;  %1951 = vmatmul.f32.gmra.mxu1 %v1898_v22 }
 0x3f1   : > { %v1900_v26 = vand.u32 4294901760, %v1899_v3  ;;  %1994 = vmatmul.f32.gmra.mxu2 %v1899_v3 }
 0x3f3   : > { %v1901_v27 = vsub.f32 %v1899_v3, %v1900_v26  ;;  %2038 = vmatmul.f32.gmra.mxu3 %v1900_v26 }
 0x3f5   : > { %v1902_v10 = vand.u32 4294901760, %v1901_v27  ;;  %2628 = vset.pattern.permute.xlu2 %v3319_v39 }
 0x3f7   : > { %1903 = vmatmul.f32.gmra.mxu0 %v1902_v10  ;;  %2104 = vmatmul.f32.vlgmr.msrb.gmra.mxu1 %v1874_v60 }
 0x3fd   : > { %2457 = vperm.xlu2 %2628, %v3294_v5  }
 0x3ff   : > { %2068 = vmatmul.f32.vlgmr.msrb.gmra.mxu0 %v1874_v60  ;;  %2108 = vmatmul.f32.gmra.mxu1 %v1882_v57 }
 0x405   : > { %v1433_v28 = vpop.trf.xlu2 }
 0x406   : > { %v1451_v40 = vsel %vm1404_vm6, %v1433_v28, 0.0  ;;  %v2440_v28 = vpop.permute.xlu0 %2439 }
 0x407   : > { %v2121_v41 = vsel %vm1842_vm5, %v1451_v40, 0  ;;  %2072 = vmatmul.f32.gmra.mxu0 %v1882_v57  ;;  %2112 = vmatmul.f32.gmra.mxu1 %v1890_v15 }
 0x408   : > { %v2151_v42 = vand.u32 4294901760, %v2121_v41 }
 0x40a   : > { %v2152_v46 = vsub.f32 %v2121_v41, %v2151_v42  ;;  %2216 = vmatmul.f32.vlgmr.msra.gmra.mxu3 %v2151_v42 }
 0x40c   : > { %v2153_v48 = vand.u32 4294901760, %v2152_v46 }
 0x40d   : > { %v1434_v51 = vpop.trf.xlu2 }
 0x40e   : > { %v2154_v59 = vsub.f32 %v2152_v46, %v2153_v48  ;;  %v1452_v5 = vsel %vm1404_vm6, %v1434_v51, 0.0 }
 0x40f   : > { %v2124_v63 = vsel %vm1842_vm5, %v1452_v5, 0  ;;  %2076 = vmatmul.f32.gmra.mxu0 %v1890_v15  ;;  %2116 = vmatmul.f32.gmra.mxu1 %v1898_v22 }
 0x410   : > { %v2159_v0 = vand.u32 4294901760, %v2124_v63  ;;  %v2155_v1 = vand.u32 4294901760, %v2154_v59 }
 0x412   : > { %v2160_v18 = vsub.f32 %v2124_v63, %v2159_v0  ;;  %2156 = vmatmul.f32.vlgmr.msra.gmra.mxu2 %v2155_v1  ;;  %2220 = vmatmul.f32.gmra.mxu3 %v2159_v0  ;;  %v2407_v1 = vpop.permute.xlu0 %2406 }
 0x414   : > { %v2161_v29 = vand.u32 4294901760, %v2160_v18 }
 0x415   : > { %v1435_v38 = vpop.trf.xlu2 }
 0x416   : > { %v1453_v36 = vsel %vm1404_vm6, %v1435_v38, 0.0  ;;  %v2162_v37 = vsub.f32 %v2160_v18, %v2161_v29 }
 0x417   : > { %v2127_v39 = vsel %vm1842_vm5, %v1453_v36, 0  ;;  %2080 = vmatmul.f32.gmra.mxu0 %v1898_v22  ;;  %2297 = vmatmul.f32.vlgmr.msra.gmra.mxu1 %v2153_v48 }
 0x418   : > { %v2167_v13 = vand.u32 4294901760, %v2127_v39  ;;  %v2163_v9 = vand.u32 4294901760, %v2162_v37 }
 0x41a   : > { %v2168_v23 = vsub.f32 %v2127_v39, %v2167_v13  ;;  %2164 = vmatmul.f32.gmra.mxu2 %v2163_v9  ;;  %2224 = vmatmul.f32.gmra.mxu3 %v2167_v13 }
 0x41c   : > { %v2169_v24 = vand.u32 4294901760, %v2168_v23 }
 0x41d   : > { %v1436_v33 = vpop.trf.xlu2 }
 0x41e   : > { %v1454_v35 = vsel %vm1404_vm6, %v1436_v33, 0.0  ;;  %v2170_v52 = vsub.f32 %v2168_v23, %v2169_v24 }
 0x41f   : > { %v2130_v34 = vsel %vm1842_vm5, %v1454_v35, 0  ;;  %2256 = vmatmul.f32.vlgmr.msra.gmra.mxu0 %v2152_v46  ;;  %2303 = vmatmul.f32.gmra.mxu1 %v2161_v29 }
 0x420   : > { %v2175_v58 = vand.u32 4294901760, %v2130_v34  ;;  %v2171_v2 = vand.u32 4294901760, %v2170_v52 }
 0x422   : > { %v2176_v54 = vsub.f32 %v2130_v34, %v2175_v58  ;;  %2172 = vmatmul.f32.gmra.mxu2 %v2171_v2  ;;  %2228 = vmatmul.f32.gmra.mxu3 %v2175_v58  ;;  %v3408_v2 = vpop.permute.xlu0 %2424 }
 0x424   : > { %v2177_v12 = vand.u32 4294901760, %v2176_v54 }
 0x426   : > { %v2178_v43 = vsub.f32 %v2176_v54, %v2177_v12 }
 0x427   : > { %2261 = vmatmul.f32.gmra.mxu0 %v2160_v18  ;;  %2309 = vmatmul.f32.gmra.mxu1 %v2169_v24 }
 0x428   : > { %v2179_v49 = vand.u32 4294901760, %v2178_v43 }
 0x42a   : > { %2180 = vmatmul.f32.gmra.mxu2 %v2179_v49  ;;  %2381 = vmatmul.f32.vlgmr.msrb.gmra.mxu3 %v2151_v42 }
 0x42f   : > { %2266 = vmatmul.f32.gmra.mxu0 %v2168_v23  ;;  %2315 = vmatmul.f32.gmra.mxu1 %v2177_v12 }
 0x432   : > { %2345 = vmatmul.f32.vlgmr.msrb.gmra.mxu2 %v2151_v42  ;;  %2385 = vmatmul.f32.gmra.mxu3 %v2159_v0 }
 0x437   : > { %2271 = vmatmul.f32.gmra.mxu0 %v2176_v54 }
 0x43a   : > { %2349 = vmatmul.f32.gmra.mxu2 %v2159_v0  ;;  %2389 = vmatmul.f32.gmra.mxu3 %v2167_v13 }
 0x442   : > { %2353 = vmatmul.f32.gmra.mxu2 %v2167_v13  ;;  %2393 = vmatmul.f32.gmra.mxu3 %v2175_v58 }
 0x44a   : > { %2357 = vmatmul.f32.gmra.mxu2 %v2175_v58 }
 0x454   : > { %v1940_v55 = vpop.f32.mrf.mxu1 }
 0x45c   : > { %v1880_v47 = vpop.f32.mrf.mxu0  ;;  %v1944_v6 = vpop.f32.mrf.mxu1 }
 0x45d   : > { %v1980_v44 = vpop.f32.mrf.mxu2  ;;  %v1941_v40 = vadd.f32 %v1940_v55, %v1880_v47 }
 0x45e   : > { %v2021_v60 = vpop.f32.mrf.mxu3 }
 0x45f   : > { %v1981_v46 = vadd.f32 %v1980_v44, %v1941_v40 }
 0x461   : > { %v2022_v0 = vadd.f32 %v2021_v60, %v1981_v46  ;;  %v2645_v46 = vld [vmem:[%s2943_s25 + $0x8] sm:$0xff] }
 0x464   : > { %v1888_v56 = vpop.f32.mrf.mxu0  ;;  %v1948_v50 = vpop.f32.mrf.mxu1 }
 0x465   : > { %v1985_v57 = vpop.f32.mrf.mxu2  ;;  %v1945_v63 = vadd.f32 %v1944_v6, %v1888_v56  ;;  %v2644_v56 = vld [vmem:[%s2943_s25] sm:$0xff] }
 0x466   : > { %v2027_v45 = vpop.f32.mrf.mxu3 }
 0x467   : > { %v1986_v36 = vadd.f32 %v1985_v57, %v1945_v63 }
 0x469   : > { %v2028_v35 = vadd.f32 %v2027_v45, %v1986_v36 }
 0x46c   : > { %v1896_v31 = vpop.f32.mrf.mxu0  ;;  %v1952_v62 = vpop.f32.mrf.mxu1 }
 0x46d   : > { %v1990_v30 = vpop.f32.mrf.mxu2  ;;  %v1949_v33 = vadd.f32 %v1948_v50, %v1896_v31 }
 0x46e   : > { %v3396_v61 = vpop.f32.mrf.mxu3 }
 0x46f   : > { %v1991_v49 = vadd.f32 %v1990_v30, %v1949_v33  ;;  %v2413_v30 = vpop.permute.xlu2 %2412 }
 0x471   : > { %v2034_v50 = vadd.f32 %v3396_v61, %v1991_v49 }
 0x474   : > { %v3394_v53 = vpop.f32.mrf.mxu0  ;;  %v2105_v32 = vpop.f32.mrf.mxu1 }
 0x475   : > { %v3400_v15 = vpop.f32.mrf.mxu2  ;;  %v1953_v45 = vadd.f32 %v1952_v62, %v3394_v53 }
 0x476   : > { %v3398_v7 = vpop.f32.mrf.mxu3 }
 0x47c   : > { %v2069_v8 = vpop.f32.mrf.mxu0  ;;  %v2109_v19 = vpop.f32.mrf.mxu1 }
 0x47d   : > { %v2070_v18 = vadd.f32 %v2069_v8, %v2022_v0 }
 0x47f   : > { %v2106_v9 = vadd.f32 %v2105_v32, %v2070_v18 }
 0x484   : > { %v2073_v14 = vpop.f32.mrf.mxu0  ;;  %v3402_v20 = vpop.f32.mrf.mxu1 }
 0x485   : > { %v2074_v54 = vadd.f32 %v2073_v14, %v2028_v35 }
 0x487   : > { %v2110_v44 = vadd.f32 %v2109_v19, %v2074_v54 }
 0x48c   : > { %v2077_v4 = vpop.f32.mrf.mxu0  ;;  %v3406_v3 = vpop.f32.mrf.mxu1 }
 0x48d   : > { %v2217_v16 = vpop.f32.mrf.mxu3 }
 0x494   : > { %v3404_v21 = vpop.f32.mrf.mxu0  ;;  %v2298_v41 = vpop.f32.mrf.mxu1 }
 0x495   : > { %v2157_v11 = vpop.f32.mrf.mxu2  ;;  %v2221_v17 = vpop.f32.mrf.mxu3 }
 0x496   : > { %v2218_v48 = vadd.f32 %v2217_v16, %v2157_v11  ;;  %v2419_v11 = vpop.permute.xlu1 %2418 }
 0x49c   : > { %v2257_v27 = vpop.f32.mrf.mxu0  ;;  %v2304_v13 = vpop.f32.mrf.mxu1 }
 0x49d   : > { %v2165_v22 = vpop.f32.mrf.mxu2  ;;  %v2225_v25 = vpop.f32.mrf.mxu3  ;;  %v2258_v51 = vadd.f32 %v2257_v27, %v2218_v48 }
 0x49e   : > { %v2222_v37 = vadd.f32 %v2221_v17, %v2165_v22  ;;  %v2078_v17 = vadd.f32 %v2077_v4, %v2034_v50  ;;  %v2446_v27 = vpop.permute.xlu0 %2445 }
 0x49f   : > { %v2299_v29 = vadd.f32 %v2298_v41, %v2258_v51 }
 0x4a0   : > { %v2114_v51 = vadd.f32 %v3402_v20, %v2078_v17 }
 0x4a4   : > { %v2262_v59 = vpop.f32.mrf.mxu0  ;;  %v2310_v32 = vpop.f32.mrf.mxu1 }
 0x4a5   : > { %v2173_v26 = vpop.f32.mrf.mxu2  ;;  %v2229_v10 = vpop.f32.mrf.mxu3  ;;  %v2263_v23 = vadd.f32 %v2262_v59, %v2222_v37 }
 0x4a6   : > { %v2226_v55 = vadd.f32 %v2225_v25, %v2173_v26  ;;  %v2452_v37 = vpop.permute.xlu1 %2451 }
 0x4a7   : > { %v2305_v43 = vadd.f32 %v2304_v13, %v2263_v23 }
 0x4ac   : > { %v2267_v52 = vpop.f32.mrf.mxu0 }
 0x4ad   : > { %v2181_v42 = vpop.f32.mrf.mxu2  ;;  %v2382_v5 = vpop.f32.mrf.mxu3  ;;  %v2268_v57 = vadd.f32 %v2267_v52, %v2226_v55 }
 0x4ae   : > { %v2230_v62 = vadd.f32 %v2229_v10, %v2181_v42 }
 0x4af   : > { %v2311_v26 = vadd.f32 %v2310_v32, %v2268_v57 }
 0x4b4   : > { %v2272_v22 = vpop.f32.mrf.mxu0 }
 0x4b5   : > { %v2346_v38 = vpop.f32.mrf.mxu2  ;;  %v2386_v58 = vpop.f32.mrf.mxu3  ;;  %v2273_v4 = vadd.f32 %v2272_v22, %v2230_v62 }
 0x4b6   : > { %v2347_v39 = vadd.f32 %v2346_v38, %v2299_v29  ;;  %v2316_v29 = vpop.f32.mrf.mxu1 }
 0x4b7   : > { %v2317_v38 = vadd.f32 %v2316_v29, %v2273_v4 }
 0x4b8   : > { %v2383_v24 = vadd.f32 %v2382_v5, %v2347_v39 }
 0x4ba   : > { %v2397_v34 = vmul.f32 %v2383_v24, %v2106_v9 }
 0x4bc   : > { %v2426_v12 = vadd.f32 %v2407_v1, %v2397_v34 }
 0x4bd   : > { %v2350_v47 = vpop.f32.mrf.mxu2  ;;  %v2390_v40 = vpop.f32.mrf.mxu3 }
 0x4be   : > { %v2430_v60 = vmul.f32 %v2644_v56, %v2426_v12  ;;  %v2351_v6 = vadd.f32 %v2350_v47, %v2305_v43  ;;  %v2458_v43 = vpop.permute.xlu2 %2457  ;;  %v2647_v47 = vld [vmem:[%s2943_s25 + $0x18] sm:$0xff] }
 0x4c0   : > { %v2459_v8 = vadd.f32 %v2440_v28, %v2430_v60  ;;  %v2387_v31 = vadd.f32 %v2386_v58, %v2351_v6  ;;  %v1996_v28 = vadd.f32 %v3400_v15, %v1953_v45 }
 0x4c2   : > { %v2463_v16 = vadd.f32 3.0, %v2459_v8  ;;  %v2398_v14 = vmul.f32 %v2387_v31, %v2110_v44  ;;  %v2040_v0 = vadd.f32 %v3398_v7, %v1996_v28  ;;  %v2646_v7 = vld [vmem:[%s2943_s25 + $0x10] sm:$0xff]  ;;  %s2488_s25 = scalar_lea.sflag [#allocation3], %s323_s21 }
 0x4c4   : > { %v2467_v25 = vmax.f32 %v2463_v16, 0.0  ;;  %v2427_v19 = vadd.f32 %v2413_v30, %v2398_v14  ;;  %v2082_v10 = vadd.f32 %v3404_v21, %v2040_v0 }
 0x4c5   : > { %v2354_v53 = vpop.f32.mrf.mxu2  ;;  %v2394_v23 = vpop.f32.mrf.mxu3 }
 0x4c6   : > { %v2471_v61 = vmin.f32 %v2467_v25, 6.0  ;;  %v2355_v41 = vadd.f32 %v2354_v53, %v2311_v26  ;;  %v2431_v48 = vmul.f32 %v2645_v46, %v2427_v19  ;;  %v2118_v24 = vadd.f32 %v3406_v3, %v2082_v10 }
 0x4c8   : > { %v2475_v59 = vmul.f32 %v2471_v61, %v2459_v8  ;;  %v2391_v5 = vadd.f32 %v2390_v40, %v2355_v41  ;;  %v2460_v63 = vadd.f32 %v2446_v27, %v2431_v48 }
 0x4ca   : > { %v2479_v1 = vmul.f32 0.16666667, %v2475_v59  ;;  %v2399_v15 = vmul.f32 %v2391_v5, %v2114_v51  ;;  %v2464_v18 = vadd.f32 3.0, %v2460_v63 }
 0x4cc   : > { %v2468_v42 = vmax.f32 %v2464_v18, 0.0  ;;  %2483 = vst [vmem:[%s3421_s23] sm:$0xff] %v2479_v1  ;;  %v2428_v20 = vadd.f32 %v2419_v11, %v2399_v15 }
 0x4cd   : > { %v2358_v36 = vpop.f32.mrf.mxu2 }
 0x4ce   : > { %v2472_v39 = vmin.f32 %v2468_v42, 6.0  ;;  %v2359_v13 = vadd.f32 %v2358_v36, %v2317_v38  ;;  %v2432_v9 = vmul.f32 %v2646_v7, %v2428_v20 }
 0x4d0   : > { %v2476_v21 = vmul.f32 %v2472_v39, %v2460_v63  ;;  %v2395_v33 = vadd.f32 %v2394_v23, %v2359_v13  ;;  %v2461_v35 = vadd.f32 %v2452_v37, %v2432_v9 }
 0x4d2   : > { %v2480_v52 = vmul.f32 0.16666667, %v2476_v21  ;;  %v2400_v34 = vmul.f32 %v2395_v33, %v2118_v24  ;;  %v2465_v58 = vadd.f32 3.0, %v2461_v35 }
 0x4d4   : > { %2484 = vst [vmem:[%s3421_s23 + $0x8] sm:$0xff] %v2480_v52  ;;  %v2469_v54 = vmax.f32 %v2465_v58, 0.0  ;;  %v2429_v12 = vadd.f32 %v3408_v2, %v2400_v34 }
 0x4d6   : > { %v2473_v49 = vmin.f32 %v2469_v54, 6.0  ;;  %v2433_v55 = vmul.f32 %v2647_v47, %v2429_v12 }
 0x4d8   : > { %v2477_v56 = vmul.f32 %v2473_v49, %v2461_v35  ;;  %v2462_v3 = vadd.f32 %v2458_v43, %v2433_v55 }
 0x4da   : > { %v2481_v60 = vmul.f32 0.16666667, %v2477_v56  ;;  %v2466_v6 = vadd.f32 3.0, %v2462_v3 }
 0x4dc   : > { %2485 = vst [vmem:[%s3421_s23 + $0x10] sm:$0xff] %v2481_v60  ;;  %v2470_v44 = vmax.f32 %v2466_v6, 0.0 }
 0x4de   : > { %v2474_v2 = vmin.f32 %v2470_v44, 6.0 }
 0x4e0   : > { %v2478_v57 = vmul.f32 %v2474_v2, %v2462_v3 }
 0x4e2   : > { %v2482_v8 = vmul.f32 0.16666667, %v2478_v57 }
 0x4e4   : > { %2486 = vst [vmem:[%s3421_s23 + $0x18] sm:$0xff] %v2482_v8 }
 0x4e5   : > { %2675 = shalt.err (!%p2672_p3)
}
 0x4e6   : > { %s2714_s21 = smov 128   ;;  %s2715_s23 = smov 8  }
 0x4e7   : > { %2579 = dma.vmem_to_hbm [thread:$0]  (%p2804_p5), %s2501_s29, 512, %s2503_s14, %s2488_s25, %s2714_s21, %s2714_s21, %s2715_s23  }
 0x4e8 PF: > { %p2585_p4 = scmp.ge.s32.totalorder %s2710_s12, 2  ;;  %s2517_s28 = sand.u32 1, %s2698_s30  }
 0x4e9   : > { %s2518_s17 = scalar_lea.sflag [#allocation3], %s2517_s28 }
 0x4ea   : > { %p2582_p7 = pnand %p2585_p4, %p2808_p6 }
 0x4ec   : > { %p2583_p8 = pneg %p2582_p7 }
 0x4ee   : > { %2693 = dma.done.wait (%p2583_p8), %s2518_s17, 512  }
 0x4ef   : > { %2695 = vsyncadd (%p2583_p8), %s2518_s17, 4294966784  ;;  %p19_p9 = scmp.ge.s32.totalorder %s2791_s15, 4   ;;  %s3483_s30 = smov %s2702_s10 }
 0x4f0   : > { %s3484_s10 = smov %s2706_s11  ;;  %s3485_s11 = smov %s2802_s18 }
 0x4f1   : > { %s3486_s12 = smov %s2791_s15  ;;  %21 = sbr.rel (!%p19_p9) target bundleno = 3 (0x3), region = 91 }
 0x4f6   :  { %2524 = vsyncpa [#allocation3], 1 }
 0x4f7   :  { %2526 = vsyncpa [#allocation3 + $0x1], 1 }

</bundles_post_ra>
